<compile_context>
chip_gen: v7x
topology: tpu7x:2x2x1
jax: 0.10.0
libtpu: 0.0.40
codegen_flags: <defaults>
</compile_context>

<pallas_src>
import jax
import jax.numpy as jnp
from jax.experimental import pallas as pl
from jax.experimental.pallas import tpu as pltpu


def _round_up(x, m):
    return ((x + m - 1) // m) * m


def autoencoder_kernel(x_ref,
                       w1_ref, b1_ref, w2_ref, b2_ref, w34_ref, b34_ref,
                       w5_ref, b5_ref, w6_ref, b6_ref,
                       o_ref):
    """Fused encoder->decoder forward for one (bm, dim) batch tile.

    The bottleneck pair (Linear3 with no activation, then Linear4) is folded on
    the host into a single (dim/16 x dim/16) matmul, so 5 dense layers here.
    """
    compute_t = jnp.bfloat16  # MXU operand dtype; accumulation stays f32.

    def dense(h, w_ref, b_ref, relu):
        y = jnp.dot(h.astype(compute_t), w_ref[...],
                    preferred_element_type=jnp.float32)
        y = y + b_ref[...]                      # bias-add / ReLU stay in f32 (VPU)
        return jnp.maximum(y, 0.0) if relu else y

    h = x_ref[...]                              # bf16 tile straight off HBM
    h = dense(h, w1_ref, b1_ref, relu=True)     # dim      -> dim/4
    h = dense(h, w2_ref, b2_ref, relu=True)     # dim/4    -> dim/16
    h = dense(h, w34_ref, b34_ref, relu=True)   # dim/16 -> (dim/64) -> dim/16 (folded)
    h = dense(h, w5_ref, b5_ref, relu=True)     # dim/16   -> dim/4
    h = dense(h, w6_ref, b6_ref, relu=False)    # dim/4    -> dim (reconstruction)
    o_ref[...] = h.astype(o_ref.dtype)


def _fold_bottleneck(params):
    """[(W1,b1)..(W6,b6)] -> [(W1,b1),(W2,b2),(W34,b34),(W5,b5),(W6,b6)].

    Valid because layer 3 (bottleneck) has no activation:
      (h W3 + b3) W4 + b4 == h (W3 W4) + (b3 W4 + b4).
    """
    (w1, b1), (w2, b2), (w3, b3), (w4, b4), (w5, b5), (w6, b6) = params
    w3f = w3.astype(jnp.float32)
    w4f = w4.astype(jnp.float32)
    w34 = (w3f @ w4f).astype(w3.dtype)
    b34 = (b3.astype(jnp.float32) @ w4f + b4.astype(jnp.float32)).astype(b4.dtype)
    return [(w1, b1), (w2, b2), (w34, b34), (w5, b5), (w6, b6)]


def _choose_bm(B, bm_req):
    """Pick the batch-tile size.

    * Multiple of 16 rows (bf16 sublane packing) unless the whole batch fits in
      one block (full-array dims are always legal).
    * Grid length kept even and >= 2 when B is large enough, so both v7x
      TensorCores get balanced work; irrelevant (but harmless) on v5e/v6e.
    * No padding: the last block may overhang B; Pallas masks the OOB writes.
    """
    bm_req = max(16, int(bm_req))
    if B < 32:
        return B                       # single full-batch block
    n = max(2, pl.cdiv(B, bm_req))     # at least 2 grid steps
    if n % 2:
        n += 1                         # even grid -> balanced across 2 TCs (v7x)
    return _round_up(pl.cdiv(B, n), 16)


def autoencoder_forward(x, params, *, bm=1024):
    """x: (B, dim), bf16 preferred. params: 6 (W, b) pairs, W (fan_in, fan_out) bf16,
    b (1, fan_out) f32, matching the PyTorch module's layer order."""
    B, dim = x.shape
    assert dim >= 64 and dim % 64 == 0, "dim must be a positive multiple of 64"

    layers = _fold_bottleneck(params)

    bm = _choose_bm(B, bm)
    grid = (pl.cdiv(B, bm),)

    def x_map(i):
        return (i, 0)

    def const_map(i):
        return (0, 0)

    in_specs = [pl.BlockSpec((bm, dim), x_map)]          # streamed batch tiles
    flat_params = []
    for (w, b) in layers:
        in_specs.append(pl.BlockSpec(w.shape, const_map))   # fully VMEM-resident
        in_specs.append(pl.BlockSpec(b.shape, const_map))
        flat_params.extend([w, b])
    # TODO(synk): once 2x param_bytes + 4 x/out tiles approaches ~80% of VMEM
    # (dim ~5-6k on v7x's 64 MiB/TC), tile W1/W6 over a K/N grid axis instead of
    # keeping them fully resident.

    out_specs = pl.BlockSpec((bm, dim), x_map)

    # VMEM budget: double-buffered x/out tiles + resident params + headroom,
    # capped at ~85% of this chip's VMEM (128 MiB v5e/v6e, 64 MiB v7x).
    param_bytes = sum(int(w.size) * w.dtype.itemsize + int(b.size) * b.dtype.itemsize
                      for (w, b) in layers)
    tile_bytes = bm * dim * x.dtype.itemsize
    needed = 2 * param_bytes + 4 * tile_bytes
    try:
        vmem_cap = int(pltpu.get_tpu_info().vmem_capacity_bytes)
    except Exception:
        vmem_cap = 64 * 2**20
    vmem_bytes = int(min(max(2 * needed, 32 * 2**20), int(vmem_cap * 0.85)))

    flops = 2 * B * sum(int(w.shape[0]) * int(w.shape[1]) for (w, _) in layers)
    bytes_accessed = 2 * B * dim * x.dtype.itemsize + param_bytes
    cost = pl.CostEstimate(flops=flops, transcendentals=0,
                           bytes_accessed=bytes_accessed)

    return pl.pallas_call(
        autoencoder_kernel,
        out_shape=jax.ShapeDtypeStruct((B, dim), x.dtype),
        grid=grid,
        in_specs=in_specs,
        out_specs=out_specs,
        compiler_params=pltpu.CompilerParams(
            dimension_semantics=("parallel",),
            vmem_limit_bytes=vmem_bytes),
        cost_estimate=cost,
    )(x, *flat_params)


def init_params(key, dim):
    """nn.Linear-style init. Weights stored (fan_in, fan_out) bf16; biases (1, fan_out) f32.

    Layer sizes: dim -> dim//4 -> dim//16 -> dim//64 -> dim//16 -> dim//4 -> dim
    """
    sizes = [dim, dim // 4, dim // 16, dim // 64, dim // 16, dim // 4, dim]
    params = []
    for li in range(6):
        fan_in, fan_out = sizes[li], sizes[li + 1]
        key, kw, kb = jax.random.split(key, 3)
        bound = 1.0 / float(fan_in) ** 0.5
        w = jax.random.uniform(kw, (fan_in, fan_out), jnp.float32, -bound, bound)
        b = jax.random.uniform(kb, (1, fan_out), jnp.float32, -bound, bound)
        params.append((w.astype(jnp.bfloat16), b))
    return params


def reference_forward(x, params):
    """Pure-JAX f32 reference of the PyTorch forward (weights read from bf16 storage)."""
    h = x.astype(jnp.float32)
    for li, (w, b) in enumerate(params):
        h = h @ w.astype(jnp.float32) + b.astype(jnp.float32)
        if li in (0, 1, 3, 4):  # ReLU after every layer except bottleneck & final
            h = jnp.maximum(h, 0.0)
    return h


if __name__ == "__main__":
    dim = 256      # multiple of 64 (bottleneck = dim // 64 = 4) and of 128 lanes
    batch = 512    # _choose_bm -> bm=256, grid=(2,): both v7x TensorCores busy

    key = jax.random.PRNGKey(0)
    key, kx = jax.random.split(key)
    x = jax.random.normal(kx, (batch, dim), dtype=jnp.float32).astype(jnp.bfloat16)

    params = init_params(jax.random.PRNGKey(0), dim)

    out = autoencoder_forward(x, params)
    out = jax.block_until_ready(out)

    ref = reference_forward(x, params)
    assert out.shape == (batch, dim)
    out_f32 = out.astype(jnp.float32)
    max_err = float(jnp.max(jnp.abs(out_f32 - ref)))
    assert jnp.allclose(out_f32, ref, atol=3e-2, rtol=3e-2), \
        f"mismatch vs reference (max abs err={max_err})"

    print("KERNEL_OK")
</pallas_src>

<mosaic_0001>
module attributes {stable_mosaic.version = 11 : i64} {
  func.func @autoencoder_kernel(%arg0: i32, %arg1: memref<256x256xbf16, #tpu.memory_space<vmem>>, %arg2: memref<256x64xbf16, #tpu.memory_space<vmem>>, %arg3: memref<1x64xf32, #tpu.memory_space<vmem>>, %arg4: memref<64x16xbf16, #tpu.memory_space<vmem>>, %arg5: memref<1x16xf32, #tpu.memory_space<vmem>>, %arg6: memref<16x16xbf16, #tpu.memory_space<vmem>>, %arg7: memref<1x16xf32, #tpu.memory_space<vmem>>, %arg8: memref<16x64xbf16, #tpu.memory_space<vmem>>, %arg9: memref<1x64xf32, #tpu.memory_space<vmem>>, %arg10: memref<64x256xbf16, #tpu.memory_space<vmem>>, %arg11: memref<1x256xf32, #tpu.memory_space<vmem>>, %arg12: memref<256x256xbf16, #tpu.memory_space<vmem>>) attributes {dimension_semantics = [#tpu.dimension_semantics<parallel>], iteration_bounds = array<i64: 2>, scalar_prefetch = 0 : i64, scratch_operands = 0 : i64, tpu.core_type = #tpu.core_type<tc>, window_params = [{transform_indices = @transform_0, window_bounds = array<i64: 256, 256>}, {pipeline_mode = #tpu.pipeline_mode<synchronous>, transform_indices = @transform_1, window_bounds = array<i64: 256, 64>}, {pipeline_mode = #tpu.pipeline_mode<synchronous>, transform_indices = @transform_2, window_bounds = array<i64: 1, 64>}, {pipeline_mode = #tpu.pipeline_mode<synchronous>, transform_indices = @transform_3, window_bounds = array<i64: 64, 16>}, {pipeline_mode = #tpu.pipeline_mode<synchronous>, transform_indices = @transform_4, window_bounds = array<i64: 1, 16>}, {pipeline_mode = #tpu.pipeline_mode<synchronous>, transform_indices = @transform_5, window_bounds = array<i64: 16, 16>}, {pipeline_mode = #tpu.pipeline_mode<synchronous>, transform_indices = @transform_6, window_bounds = array<i64: 1, 16>}, {pipeline_mode = #tpu.pipeline_mode<synchronous>, transform_indices = @transform_7, window_bounds = array<i64: 16, 64>}, {pipeline_mode = #tpu.pipeline_mode<synchronous>, transform_indices = @transform_8, window_bounds = array<i64: 1, 64>}, {pipeline_mode = #tpu.pipeline_mode<synchronous>, transform_indices = @transform_9, window_bounds = array<i64: 64, 256>}, {pipeline_mode = #tpu.pipeline_mode<synchronous>, transform_indices = @transform_10, window_bounds = array<i64: 1, 256>}, {transform_indices = @transform_11, window_bounds = array<i64: 256, 256>}]} {
    %c0 = arith.constant 0 : index
    %c0_0 = arith.constant 0 : index
    %0 = vector.load %arg1[%c0, %c0_0] : memref<256x256xbf16, #tpu.memory_space<vmem>>, vector<256x256xbf16>
    %c0_1 = arith.constant 0 : index
    %c0_2 = arith.constant 0 : index
    %1 = vector.load %arg2[%c0_1, %c0_2] : memref<256x64xbf16, #tpu.memory_space<vmem>>, vector<256x64xbf16>
    %cst = arith.constant dense<0.000000e+00> : vector<256x64xf32>
    %2 = tpu.matmul %0, %1, %cst {dimension_numbers = #tpu.dot_dimension_numbers<[1], [0], [0], [1], [0, 0, 1, 1], [], []>} : vector<256x256xbf16>, vector<256x64xbf16>, vector<256x64xf32> -> vector<256x64xf32>
    %c0_3 = arith.constant 0 : index
    %c0_4 = arith.constant 0 : index
    %3 = vector.load %arg3[%c0_3, %c0_4] : memref<1x64xf32, #tpu.memory_space<vmem>>, vector<1x64xf32>
    %4 = vector.broadcast %3 : vector<1x64xf32> to vector<256x64xf32>
    %5 = arith.addf %2, %4 : vector<256x64xf32>
    %cst_5 = arith.constant 0.000000e+00 : f32
    %6 = vector.broadcast %cst_5 : f32 to vector<256x64xf32>
    %7 = arith.maximumf %5, %6 : vector<256x64xf32>
    %8 = arith.truncf %7 : vector<256x64xf32> to vector<256x64xbf16>
    %c0_6 = arith.constant 0 : index
    %c0_7 = arith.constant 0 : index
    %9 = vector.load %arg4[%c0_6, %c0_7] : memref<64x16xbf16, #tpu.memory_space<vmem>>, vector<64x16xbf16>
    %cst_8 = arith.constant dense<0.000000e+00> : vector<256x16xf32>
    %10 = tpu.matmul %8, %9, %cst_8 {dimension_numbers = #tpu.dot_dimension_numbers<[1], [0], [0], [1], [0, 0, 1, 1], [], []>} : vector<256x64xbf16>, vector<64x16xbf16>, vector<256x16xf32> -> vector<256x16xf32>
    %c0_9 = arith.constant 0 : index
    %c0_10 = arith.constant 0 : index
    %11 = vector.load %arg5[%c0_9, %c0_10] : memref<1x16xf32, #tpu.memory_space<vmem>>, vector<1x16xf32>
    %12 = vector.broadcast %11 : vector<1x16xf32> to vector<256x16xf32>
    %13 = arith.addf %10, %12 : vector<256x16xf32>
    %cst_11 = arith.constant 0.000000e+00 : f32
    %14 = vector.broadcast %cst_11 : f32 to vector<256x16xf32>
    %15 = arith.maximumf %13, %14 : vector<256x16xf32>
    %16 = arith.truncf %15 : vector<256x16xf32> to vector<256x16xbf16>
    %c0_12 = arith.constant 0 : index
    %c0_13 = arith.constant 0 : index
    %17 = vector.load %arg6[%c0_12, %c0_13] : memref<16x16xbf16, #tpu.memory_space<vmem>>, vector<16x16xbf16>
    %cst_14 = arith.constant dense<0.000000e+00> : vector<256x16xf32>
    %18 = tpu.matmul %16, %17, %cst_14 {dimension_numbers = #tpu.dot_dimension_numbers<[1], [0], [0], [1], [0, 0, 1, 1], [], []>} : vector<256x16xbf16>, vector<16x16xbf16>, vector<256x16xf32> -> vector<256x16xf32>
    %c0_15 = arith.constant 0 : index
    %c0_16 = arith.constant 0 : index
    %19 = vector.load %arg7[%c0_15, %c0_16] : memref<1x16xf32, #tpu.memory_space<vmem>>, vector<1x16xf32>
    %20 = vector.broadcast %19 : vector<1x16xf32> to vector<256x16xf32>
    %21 = arith.addf %18, %20 : vector<256x16xf32>
    %cst_17 = arith.constant 0.000000e+00 : f32
    %22 = vector.broadcast %cst_17 : f32 to vector<256x16xf32>
    %23 = arith.maximumf %21, %22 : vector<256x16xf32>
    %24 = arith.truncf %23 : vector<256x16xf32> to vector<256x16xbf16>
    %c0_18 = arith.constant 0 : index
    %c0_19 = arith.constant 0 : index
    %25 = vector.load %arg8[%c0_18, %c0_19] : memref<16x64xbf16, #tpu.memory_space<vmem>>, vector<16x64xbf16>
    %cst_20 = arith.constant dense<0.000000e+00> : vector<256x64xf32>
    %26 = tpu.matmul %24, %25, %cst_20 {dimension_numbers = #tpu.dot_dimension_numbers<[1], [0], [0], [1], [0, 0, 1, 1], [], []>} : vector<256x16xbf16>, vector<16x64xbf16>, vector<256x64xf32> -> vector<256x64xf32>
    %c0_21 = arith.constant 0 : index
    %c0_22 = arith.constant 0 : index
    %27 = vector.load %arg9[%c0_21, %c0_22] : memref<1x64xf32, #tpu.memory_space<vmem>>, vector<1x64xf32>
    %28 = vector.broadcast %27 : vector<1x64xf32> to vector<256x64xf32>
    %29 = arith.addf %26, %28 : vector<256x64xf32>
    %cst_23 = arith.constant 0.000000e+00 : f32
    %30 = vector.broadcast %cst_23 : f32 to vector<256x64xf32>
    %31 = arith.maximumf %29, %30 : vector<256x64xf32>
    %32 = arith.truncf %31 : vector<256x64xf32> to vector<256x64xbf16>
    %c0_24 = arith.constant 0 : index
    %c0_25 = arith.constant 0 : index
    %33 = vector.load %arg10[%c0_24, %c0_25] : memref<64x256xbf16, #tpu.memory_space<vmem>>, vector<64x256xbf16>
    %cst_26 = arith.constant dense<0.000000e+00> : vector<256x256xf32>
    %34 = tpu.matmul %32, %33, %cst_26 {dimension_numbers = #tpu.dot_dimension_numbers<[1], [0], [0], [1], [0, 0, 1, 1], [], []>} : vector<256x64xbf16>, vector<64x256xbf16>, vector<256x256xf32> -> vector<256x256xf32>
    %c0_27 = arith.constant 0 : index
    %c0_28 = arith.constant 0 : index
    %35 = vector.load %arg11[%c0_27, %c0_28] : memref<1x256xf32, #tpu.memory_space<vmem>>, vector<1x256xf32>
    %36 = vector.broadcast %35 : vector<1x256xf32> to vector<256x256xf32>
    %37 = arith.addf %34, %36 : vector<256x256xf32>
    %38 = arith.truncf %37 : vector<256x256xf32> to vector<256x256xbf16>
    %c0_29 = arith.constant 0 : index
    %c0_30 = arith.constant 0 : index
    %39 = vector.load %arg12[%c0_29, %c0_30] : memref<256x256xbf16, #tpu.memory_space<vmem>>, vector<256x256xbf16>
    tpu.vector_store %arg12[%c0_29, %c0_30], %38 {strides = array<i32>} : memref<256x256xbf16, #tpu.memory_space<vmem>>, vector<256x256xbf16>,
    return
  }
  func.func @transform_0(%arg0: i32) -> (i32, i32) {
    %c0_i32 = arith.constant 0 : i32
    %c0_i32_0 = arith.constant 0 : i32
    return %arg0, %c0_i32 : i32, i32
  }
  func.func @transform_1(%arg0: i32) -> (i32, i32) {
    %c0_i32 = arith.constant 0 : i32
    %c0_i32_0 = arith.constant 0 : i32
    %c0_i32_1 = arith.constant 0 : i32
    return %c0_i32, %c0_i32_0 : i32, i32
  }
  func.func @transform_2(%arg0: i32) -> (i32, i32) {
    %c0_i32 = arith.constant 0 : i32
    %c0_i32_0 = arith.constant 0 : i32
    %c0_i32_1 = arith.constant 0 : i32
    return %c0_i32, %c0_i32_0 : i32, i32
  }
  func.func @transform_3(%arg0: i32) -> (i32, i32) {
    %c0_i32 = arith.constant 0 : i32
    %c0_i32_0 = arith.constant 0 : i32
    %c0_i32_1 = arith.constant 0 : i32
    return %c0_i32, %c0_i32_0 : i32, i32
  }
  func.func @transform_4(%arg0: i32) -> (i32, i32) {
    %c0_i32 = arith.constant 0 : i32
    %c0_i32_0 = arith.constant 0 : i32
    %c0_i32_1 = arith.constant 0 : i32
    return %c0_i32, %c0_i32_0 : i32, i32
  }
  func.func @transform_5(%arg0: i32) -> (i32, i32) {
    %c0_i32 = arith.constant 0 : i32
    %c0_i32_0 = arith.constant 0 : i32
    %c0_i32_1 = arith.constant 0 : i32
    return %c0_i32, %c0_i32_0 : i32, i32
  }
  func.func @transform_6(%arg0: i32) -> (i32, i32) {
    %c0_i32 = arith.constant 0 : i32
    %c0_i32_0 = arith.constant 0 : i32
    %c0_i32_1 = arith.constant 0 : i32
    return %c0_i32, %c0_i32_0 : i32, i32
  }
  func.func @transform_7(%arg0: i32) -> (i32, i32) {
    %c0_i32 = arith.constant 0 : i32
    %c0_i32_0 = arith.constant 0 : i32
    %c0_i32_1 = arith.constant 0 : i32
    return %c0_i32, %c0_i32_0 : i32, i32
  }
  func.func @transform_8(%arg0: i32) -> (i32, i32) {
    %c0_i32 = arith.constant 0 : i32
    %c0_i32_0 = arith.constant 0 : i32
    %c0_i32_1 = arith.constant 0 : i32
    return %c0_i32, %c0_i32_0 : i32, i32
  }
  func.func @transform_9(%arg0: i32) -> (i32, i32) {
    %c0_i32 = arith.constant 0 : i32
    %c0_i32_0 = arith.constant 0 : i32
    %c0_i32_1 = arith.constant 0 : i32
    return %c0_i32, %c0_i32_0 : i32, i32
  }
  func.func @transform_10(%arg0: i32) -> (i32, i32) {
    %c0_i32 = arith.constant 0 : i32
    %c0_i32_0 = arith.constant 0 : i32
    %c0_i32_1 = arith.constant 0 : i32
    return %c0_i32, %c0_i32_0 : i32, i32
  }
  func.func @transform_11(%arg0: i32) -> (i32, i32) {
    %c0_i32 = arith.constant 0 : i32
    %c0_i32_0 = arith.constant 0 : i32
    return %arg0, %c0_i32 : i32, i32
  }
}

</mosaic_0001>

<bundles_post_ra>
// kernel: tpu_custom_call.1
= control target key start
LH: loop header
LB: loop body
LE: loop exit
PB: predicated region body
PF: predicated region fallthrough
CT: control target
= control target key end

     0   :  { %16 = vsyncpa [#allocation3], 0  ;;  %s3818_s0 = inlined_call_operand.hbm [shape: bf16[512,256], index: 0, kind: input, shape index: {}]   ;;  %s3819_s1 = inlined_call_operand.vmem [shape: bf16[256,64], index: 1, kind: input, shape index: {}]   ;;  %s3820_s2 = inlined_call_operand.vmem [shape: f32[1,64], index: 2, kind: input, shape index: {}]   ;;  %s3821_s3 = inlined_call_operand.vmem [shape: bf16[64,16], index: 3, kind: input, shape index: {}]   ;;  %s3822_s4 = inlined_call_operand.vmem [shape: f32[1,16], index: 4, kind: input, shape index: {}]   ;;  %s3823_s5 = inlined_call_operand.vmem [shape: bf16[16,16], index: 5, kind: input, shape index: {}]   ;;  %s3824_s6 = inlined_call_operand.vmem [shape: f32[1,16], index: 6, kind: input, shape index: {}]   ;;  %s3825_s7 = inlined_call_operand.vmem [shape: bf16[16,64], index: 7, kind: input, shape index: {}]   ;;  %s3826_s8 = inlined_call_operand.vmem [shape: f32[1,64], index: 8, kind: input, shape index: {}]   ;;  %s3827_s9 = inlined_call_operand.vmem [shape: bf16[64,256], index: 9, kind: input, shape index: {}]   ;;  %s3828_s10 = inlined_call_operand.vmem [shape: f32[1,256], index: 10, kind: input, shape index: {}]   ;;  %s3829_s11 = inlined_call_operand.hbm [shape: bf16[512,256], index: 11, kind: output, shape index: {}]  }
   0x1   :  { %18 = vsyncpa [#allocation3 + $0x1], 0 }
   0x2   :  { %19 = vsyncpa [#allocation4], 0 }
   0x3   :  { %21 = vsyncpa [#allocation4 + $0x1], 0  ;;  %s3194_s17 = smov 0   ;;  %s3196_s18 = smov 0  }
   0x4   :  { %s3198_s19 = smov 0   ;;  %s3200_s20 = smov 0  }
   0x5 LB: > { %3833 = sst [smem:[#allocation8_spill]] %s3121_s19  ;;  %s3215_s21 = sadd.s32 4294967295, %s3125_s20   ;;  %s3125_s20 = sphi %s3200_s20, %s3848_s20   ;;  %s3121_s19 = sphi %s3198_s19, %s3845_s19   ;;  %s3117_s18 = sphi %s3196_s18, %s3847_s18   ;;  %s3113_s17 = sphi %s3194_s17, %s3846_s17  }
   0x6   : > { %s2400_s22 = sadd.s32 4294967294, %s3125_s20   ;;  %s3219_s23 = sadd.s32 1, %s3125_s20  }
   0x7   : > { %s34_s24 = sadd.s32 1, %s3121_s19  ;;  %s31_s25 = ssub.s32 %s3125_s20, %s3219_s23 }
   0x8   : > { %p41_p0 = scmp.ne.s32.totalorder %s3121_s19, %s3117_s18  ;;  %p32_p1 = scmp.eq.s32.totalorder %s31_s25, 0 }
   0x9   : > { %p42_p2 = scmp.eq.s32.totalorder %s3125_s20, 0  ;;  %p47_p3 = scmp.ne.s32.totalorder %s3117_s18, %s3113_s17 }
   0xa   : > { %p48_p4 = scmp.eq.s32.totalorder %s3215_s21, 0  ;;  %p281_p7 = scmp.eq.s32.totalorder %s3215_s21, 1 }
   0xb   : > { %s3231_s26 = scalar_select %p32_p1, %s3121_s19, %s34_s24  }
   0xc   : > { %p3233_p5 = por %p42_p2, %p41_p0  ;;  %p3237_p6 = por %p48_p4, %p47_p3 }
   0xd   : > { %3834 = sst [smem:[#allocation9_spill]] %s3231_s26  ;;  %p287_p8 = scmp.eq.s32.totalorder %s2400_s22, 1 }
   0xe   : > { %p2908_p10 = scmp.lt.s32.totalorder %s3125_s20, 2  ;;  %p3244_p11 = por %p281_p7, %p41_p0 }
   0xf   : > { %p3248_p12 = por %p287_p8, %p47_p3  ;;  %s337_s12 = sand.u32 1, %s3121_s19  }
  0x10   : > { %s3837_s29 = scalar_select %p3244_p11, 1, 0 }
  0x11   : > { %s3838_s30 = scalar_select %p3248_p12, 1, 0 }
  0x12   : > { %s2579_s13 = sshll.u32 %s3125_s20, 12  ;;  %s2403_s14 = sshll.u32 %s337_s12, 8 }
  0x13   : > { %s3257_s24 = scalar_lea.hbm %s3818_s0, %s2579_s13  ;;  %s341_s22 = scalar_lea.vmem [#allocation2], %s2403_s14 }
  0x14   : > { %s349_s25 = sshll.u32 %s341_s22, 4  ;;  %p3261_p13 = pnand %p2908_p10, %p3233_p5  ;;  %s3265_s25 = int_to_ptr.vmem [resolvable:$true] %s349_s25 }
  0x15   : > { %s3267_s19 = scalar_lea.sflag [#allocation3], %s337_s12  ;;  %s3029_s15 = scalar_lea.hbm %s3257_s24, 4096 }
  0x16   : > { %p3030_p0 = scmp.ne.s32.totalorder %s3257_s24, %s3029_s15  ;;  %p3031_p1 = pneg %p3261_p13 }
  0x17   : > { %s3034_s14 = scalar_lea.hbm %s3818_s0, 8192  ;;  %p3035_p4 = scmp.lt.u32.totalorder %s3257_s24, %s3818_s0 }
  0x18   : > { %p3032_p2 = pnand %p3031_p1, %p3030_p0  ;;  %p3036_p5 = scmp.lt.u32.totalorder %s3034_s14, %s3029_s15 }
  0x19   : > { %p3038_p8 = scmp.lt.u32.totalorder %s3029_s15, %s3257_s24 }
  0x1a   : > { %p3033_p3 = pneg %p3032_p2  ;;  %p3037_p7 = por %p3036_p5, %p3035_p4 }
  0x1c   : > { %p3039_p10 = por %p3038_p8, %p3037_p7 }
  0x1e   : > { %p3040_p9 = pnand %p3039_p10, %p3033_p3 }
  0x20   : > { %3043 = shalt.err (!%p3040_p9)
}
  0x21   : > { %s3044_s12 = scalar_lea.vmem %s3265_s25, 4096  ;;  %s3127_s13 = smov [#allocation2]  }
  0x22   : > { %p3045_p0 = scmp.ne.s32.totalorder %s3265_s25, %s3044_s12  ;;  %s3049_s27 = sshll.u32 %s3127_s13, 4  ;;  %s3050_s27 = int_to_ptr.vmem [resolvable:$false] %s3049_s27 }
  0x23   : > { %s3051_s16 = scalar_lea.vmem %s3050_s27, 8192  ;;  %p3052_p11 = scmp.lt.s32.totalorder %s3265_s25, %s3050_s27 }
  0x24   : > { %p3047_p2 = pnand %p3045_p0, %p3031_p1  ;;  %p3053_p4 = scmp.lt.s32.totalorder %s3051_s16, %s3044_s12 }
  0x26   : > { %p3048_p12 = pneg %p3047_p2  ;;  %p3054_p5 = por %p3053_p4, %p3052_p11 }
  0x28   : > { %p3055_p7 = pnand %p3054_p5, %p3048_p12 }
  0x2a   : > { %3058 = shalt.err (!%p3055_p7)
}
  0x2b   : > { %s3128_s15 = smov 128   ;;  %s3129_s14 = smov 8  }
  0x2c   : > { %2903 = dma.hbm_to_vmem [thread:$0]  (!%p3261_p13), %s3257_s24, 4096, %s3265_s25, %s3267_s19, %s3128_s15, %s3128_s15, %s3129_s14  }
  0x2d   : > { %p2407_p9 = scmp.ge.s32.totalorder %s3125_s20, 1  ;;  %p357_p1 = scmp.lt.s32.totalorder %s3125_s20, 3 }
  0x2f   : > { %p358_p3 = pnand %p2407_p9, %p357_p1 }
  0x30   : > { %s3298_s22 = sand.u32 (!%p358_p3), 1, %s3117_s18  }
  0x31   : > { %361 = sbr.rel (%p358_p3) target bundleno = 1340 (0x53c), region = 64  ;;  %s3832_s12 = sshll.u32 (!%p358_p3), %s3298_s22, 8 }
  0x32   : > { %s364_s13 = scalar_lea.sflag (!%p358_p3), [#allocation3], %s3298_s22  ;;  %s3304_s27 = scalar_lea.vmem (!%p358_p3), [#allocation2], %s3832_s12 }
  0x38   : > { %3104 = dma.done.wait (%p3237_p6), %s364_s13, 4096  }
  0x39   : > { %3106 = vsyncadd (%p3237_p6), %s364_s13, 4294963200  ;;  %v2947_v0 = vld [vmem:[%s3819_s1 + $0x40] sm:$0xff]   ;;  %v2949_v2 = vld [vmem:[%s3819_s1 + $0x48] sm:$0xff]   ;;  %vm984_vm0 = vcmask 523264   ;;  %vm1257_vm1 = vcmask 130048   ;;  %s3840_s14 = sshll.u32 %s3298_s22, 8 }
  0x3a   : > { %v2948_v1 = vld [vmem:[%s3819_s1] sm:$0xff]   ;;  %2614 = vmatprep.subr.bf16.mxu0 %v2947_v0  ;;  %v2950_v3 = vld [vmem:[%s3819_s1 + $0x8] sm:$0xff]   ;;  %v2951_v4 = vld [vmem:[%s3819_s1 + $0x50] sm:$0xff]   ;;  %s3673_s28 = scalar_lea.vmem [#allocation5], %s3840_s14  ;;  %s2613_s13 = sshll.u32 %s3215_s21, 12 }
  0x3b   : > { %2615 = vmatpush3.bf16.msra.mxu0 %v2948_v1  ;;  %v2952_v5 = vld [vmem:[%s3819_s1 + $0x10] sm:$0xff]   ;;  %v2953_v6 = vld [vmem:[%s3819_s1 + $0x58] sm:$0xff]   ;;  %v2955_v8 = vld [vmem:[%s3819_s1 + $0x60] sm:$0xff]   ;;  %s2327_s19 = sshll.u32 %s3673_s28, 4  ;;  %s3770_s25 = scalar_lea.hbm %s3829_s11, %s2613_s13  ;;  %s3772_s19 = int_to_ptr.vmem [resolvable:$true] %s2327_s19 }
  0x3c   : > { %2616 = vmatprep.subr.bf16.mxu0 %v2949_v2  ;;  %v2954_v7 = vld [vmem:[%s3819_s1 + $0x18] sm:$0xff]   ;;  %v2956_v9 = vld [vmem:[%s3819_s1 + $0x20] sm:$0xff]   ;;  %v2957_v10 = vld [vmem:[%s3819_s1 + $0x68] sm:$0xff]   ;;  %s2313_s21 = scalar_lea.sflag [#allocation4], %s3298_s22  ;;  %p3841_p11 = scmp.ne.s32.totalorder %s3837_s29, 0 }
  0x3d   : > { %v2965_v11 = vld [vmem:[%s3304_s27 + $0x4] ss:$8 sps:$4 sm:$0xff]   ;;  %v2959_v13 = vld [vmem:[%s3819_s1 + $0x70] sm:$0xff]   ;;  %v2961_v15 = vld [vmem:[%s3819_s1 + $0x78] sm:$0xff]   ;;  %s3131_s16 = smov [#allocation5]  }
  0x3e   : > { %v2958_v12 = vld [vmem:[%s3819_s1 + $0x28] sm:$0xff]   ;;  %768 = vmatprep.mubr.bf16.mxu0 %v2965_v11  ;;  %v2960_v14 = vld [vmem:[%s3819_s1 + $0x30] sm:$0xff]   ;;  %v2962_v16 = vld [vmem:[%s3819_s1 + $0x38] sm:$0xff]   ;;  %s3063_s12 = sshll.u32 %s3131_s16, 4  ;;  %s3064_s12 = int_to_ptr.vmem [resolvable:$false] %s3063_s12 }
  0x3f   : > { %2617 = vmatpush3.bf16.msra.mxu0 %v2950_v3  ;;  %v2963_v17 = vld [vmem:[%s3304_s27] ss:$8 sps:$4 sm:$0xff]   ;;  %v2966_v18 = vld [vmem:[%s3304_s27 + $0x14] ss:$8 sps:$4 sm:$0xff]   ;;  %v2968_v19 = vld [vmem:[%s3304_s27 + $0x10] ss:$8 sps:$4 sm:$0xff]   ;;  %p3066_p8 = scmp.lt.s32.totalorder %s3772_s19, %s3064_s12 }
  0x40   : > { %2618 = vmatprep.subr.bf16.mxu0 %v2951_v4  ;;  %v2969_v20 = vld [vmem:[%s3304_s27 + $0x24] ss:$8 sps:$4 sm:$0xff]   ;;  %v2971_v21 = vld [vmem:[%s3304_s27 + $0x20] ss:$8 sps:$4 sm:$0xff]   ;;  %v2972_v22 = vld [vmem:[%s3304_s27 + $0x34] ss:$8 sps:$4 sm:$0xff]  }
  0x41   : > { %v2974_v23 = vld [vmem:[%s3304_s27 + $0x30] ss:$8 sps:$4 sm:$0xff]   ;;  %v2975_v24 = vld [vmem:[%s3304_s27 + $0x44] ss:$8 sps:$4 sm:$0xff]   ;;  %v2977_v25 = vld [vmem:[%s3304_s27 + $0x40] ss:$8 sps:$4 sm:$0xff]  }
  0x42   : > { %v2978_v26 = vld [vmem:[%s3304_s27 + $0x54] ss:$8 sps:$4 sm:$0xff]   ;;  %v2980_v27 = vld [vmem:[%s3304_s27 + $0x50] ss:$8 sps:$4 sm:$0xff]   ;;  %v2981_v28 = vld [vmem:[%s3304_s27 + $0x64] ss:$8 sps:$4 sm:$0xff]  }
  0x43   : > { %2619 = vmatpush3.bf16.msra.mxu0 %v2952_v5  ;;  %v2983_v29 = vld [vmem:[%s3304_s27 + $0x60] ss:$8 sps:$4 sm:$0xff]   ;;  %v2984_v30 = vld [vmem:[%s3304_s27 + $0x74] ss:$8 sps:$4 sm:$0xff]   ;;  %v2986_v31 = vld [vmem:[%s3304_s27 + $0x70] ss:$8 sps:$4 sm:$0xff]  }
  0x44   : > { %2620 = vmatprep.subr.bf16.mxu0 %v2953_v6  ;;  %v2987_v32 = vld [vmem:[%s3304_s27 + $0x84] ss:$8 sps:$4 sm:$0xff]   ;;  %v2989_v33 = vld [vmem:[%s3304_s27 + $0x80] ss:$8 sps:$4 sm:$0xff]   ;;  %v2990_v34 = vld [vmem:[%s3304_s27 + $0x94] ss:$8 sps:$4 sm:$0xff]  }
  0x45   : > { %v2992_v35 = vld [vmem:[%s3304_s27 + $0x90] ss:$8 sps:$4 sm:$0xff]   ;;  %v2993_v36 = vld [vmem:[%s3304_s27 + $0xa4] ss:$8 sps:$4 sm:$0xff]   ;;  %v2995_v37 = vld [vmem:[%s3304_s27 + $0xa0] ss:$8 sps:$4 sm:$0xff]  }
  0x46   : > { %v2996_v38 = vld [vmem:[%s3304_s27 + $0xb4] ss:$8 sps:$4 sm:$0xff]   ;;  %v2998_v39 = vld [vmem:[%s3304_s27 + $0xb0] ss:$8 sps:$4 sm:$0xff]   ;;  %v2999_v40 = vld [vmem:[%s3304_s27 + $0xc4] ss:$8 sps:$4 sm:$0xff]  }
  0x47   : > { %2621 = vmatpush3.bf16.msra.mxu0 %v2954_v7  ;;  %v3011_v41 = vld [vmem:[%s3821_s3] sm:$0xff]   ;;  %v3012_v42 = vld [vmem:[%s3821_s3 + $0x8] sm:$0xff]   ;;  %v3002_v44 = vld [vmem:[%s3304_s27 + $0xd4] ss:$8 sps:$4 sm:$0xff]   ;;  %s3065_s15 = scalar_lea.vmem %s3064_s12, 8192 }
  0x48   : > { %2622 = vmatprep.subr.bf16.mxu0 %v2955_v8  ;;  %2780 = vmatprep.subr.bf16.mxu1 %v3011_v41  ;;  %v3001_v43 = vld [vmem:[%s3304_s27 + $0xc0] ss:$8 sps:$4 sm:$0xff]   ;;  %v3013_v45 = vld [vmem:[%s3821_s3 + $0x10] sm:$0xff]   ;;  %v3014_v46 = vld [vmem:[%s3821_s3 + $0x18] sm:$0xff]  }
  0x49   : > { %2781 = vmatpush3.bf16.msra.mxu1 %v3011_v41  ;;  %v3004_v47 = vld [vmem:[%s3304_s27 + $0xd0] ss:$8 sps:$4 sm:$0xff]   ;;  %v3005_v48 = vld [vmem:[%s3304_s27 + $0xe4] ss:$8 sps:$4 sm:$0xff]   ;;  %v3007_v49 = vld [vmem:[%s3304_s27 + $0xe0] ss:$8 sps:$4 sm:$0xff]  }
  0x4a   : > { %2782 = vmatprep.subr.bf16.mxu1 %v3012_v42  ;;  %v3008_v50 = vld [vmem:[%s3304_s27 + $0xf4] ss:$8 sps:$4 sm:$0xff]   ;;  %v3010_v51 = vld [vmem:[%s3304_s27 + $0xf0] ss:$8 sps:$4 sm:$0xff]   ;;  %v3405_v53 = vld [vmem:[%s3820_s2] ss:$0 sm:$0xff] }
  0x4b   : > { %2623 = vmatpush3.bf16.msra.mxu0 %v2956_v9  ;;  %v3015_v60 = vld [vmem:[%s3823_s5] sm:$0xff]   ;;  %s3059_s27 = scalar_lea.vmem %s3772_s19, 4096 }
  0x4c   : > { %2624 = vmatprep.subr.bf16.mxu0 %v2957_v10  ;;  %p3060_p6 = scmp.ne.s32.totalorder %s3772_s19, %s3059_s27  ;;  %p3067_p10 = scmp.lt.s32.totalorder %s3065_s15, %s3059_s27 }
  0x4d   : > { %2783 = vmatpush3.bf16.msra.mxu1 %v3012_v42 }
  0x4e   : > { %2784 = vmatprep.subr.bf16.mxu1 %v3013_v45  ;;  %p3061_p12 = pnand %p3060_p6, %p3841_p11  ;;  %p3068_p0 = por %p3067_p10, %p3066_p8 }
  0x4f   : > { %2625 = vmatpush3.bf16.msra.mxu0 %v2958_v12 }
  0x50   : > { %2626 = vmatprep.subr.bf16.mxu0 %v2959_v13  ;;  %p3062_p13 = pneg %p3061_p12 }
  0x51   : > { %2785 = vmatpush3.bf16.msra.mxu1 %v3013_v45 }
  0x52   : > { %2786 = vmatprep.subr.bf16.mxu1 %v3014_v46  ;;  %p3069_p2 = pnand %p3068_p0, %p3062_p13 }
  0x53   : > { %2627 = vmatpush3.bf16.msra.mxu0 %v2960_v14 }
  0x54   : > { %2628 = vmatprep.subr.bf16.mxu0 %v2961_v15 }
  0x55   : > { %2787 = vmatpush3.bf16.msra.mxu1 %v3014_v46 }
  0x56   : > { %2820 = vmatprep.subr.bf16.mxu1 %v3015_v60 }
  0x57   : > { %2629 = vmatpush3.bf16.msra.mxu0 %v2962_v16 }
  0x5a   : > { %769 = vmatmul.mubr.bf16.vlgmr.msra.gmra.mrb[0].mxu0 %v2963_v17 }
  0x5b   : > { %776 = vmatprep.mubr.bf16.mxu0 %v2966_v18 }
  0x62   : > { %777 = vmatmul.mubr.bf16.gmra.mrb[4].mxu0 %v2968_v19 }
  0x63   : > { %784 = vmatprep.mubr.bf16.mxu0 %v2969_v20 }
  0x6a   : > { %785 = vmatmul.mubr.bf16.gmra.mrb[8].mxu0 %v2971_v21 }
  0x6b   : > { %792 = vmatprep.mubr.bf16.mxu0 %v2972_v22 }
  0x72   : > { %793 = vmatmul.mubr.bf16.gmra.mrb[12].mxu0 %v2974_v23 }
  0x73   : > { %800 = vmatprep.mubr.bf16.mxu0 %v2975_v24 }
  0x7a   : > { %801 = vmatmul.mubr.bf16.gmra.mrb[16].mxu0 %v2977_v25 }
  0x7b   : > { %808 = vmatprep.mubr.bf16.mxu0 %v2978_v26 }
  0x82   : > { %809 = vmatmul.mubr.bf16.gmra.mrb[20].mxu0 %v2980_v27 }
  0x83   : > { %816 = vmatprep.mubr.bf16.mxu0 %v2981_v28 }
  0x8a   : > { %817 = vmatmul.mubr.bf16.gmra.mrb[24].mxu0 %v2983_v29 }
  0x8b   : > { %824 = vmatprep.mubr.bf16.mxu0 %v2984_v30 }
  0x92   : > { %825 = vmatmul.mubr.bf16.gmra.mrb[28].mxu0 %v2986_v31 }
  0x93   : > { %832 = vmatprep.mubr.bf16.mxu0 %v2987_v32 }
  0x9a   : > { %833 = vmatmul.mubr.bf16.gmra.mrb[32].mxu0 %v2989_v33 }
  0x9b   : > { %840 = vmatprep.mubr.bf16.mxu0 %v2990_v34 }
  0xa2   : > { %841 = vmatmul.mubr.bf16.gmra.mrb[36].mxu0 %v2992_v35 }
  0xa3   : > { %848 = vmatprep.mubr.bf16.mxu0 %v2993_v36 }
  0xaa   : > { %849 = vmatmul.mubr.bf16.gmra.mrb[40].mxu0 %v2995_v37 }
  0xab   : > { %856 = vmatprep.mubr.bf16.mxu0 %v2996_v38 }
  0xb2   : > { %857 = vmatmul.mubr.bf16.gmra.mrb[44].mxu0 %v2998_v39 }
  0xb3   : > { %864 = vmatprep.mubr.bf16.mxu0 %v2999_v40 }
  0xba   : > { %865 = vmatmul.mubr.bf16.gmra.mrb[48].mxu0 %v3001_v43 }
  0xbb   : > { %872 = vmatprep.mubr.bf16.mxu0 %v3002_v44 }
  0xc2   : > { %873 = vmatmul.mubr.bf16.gmra.mrb[52].mxu0 %v3004_v47 }
  0xc3   : > { %880 = vmatprep.mubr.bf16.mxu0 %v3005_v48 }
  0xca   : > { %881 = vmatmul.mubr.bf16.gmra.mrb[56].mxu0 %v3007_v49 }
  0xcb   : > { %888 = vmatprep.mubr.bf16.mxu0 %v3008_v50 }
  0xd2   : > { %889 = vmatmul.mubr.bf16.gmra.mrb[60].mxu0 %v3010_v51 }
 0x12d   : > { %v2630_v52 = vpop.f32.mrb[0].mxu0 }
 0x12e   : > { %v2631_v54 = vpop.f32.mrb[1].mxu0 }
 0x12f   : > { %v2632_v55 = vadd.f32 %v2631_v54, %v2630_v52  ;;  %v2633_v56 = vpop.f32.mrb[2].mxu0 }
 0x130   : > { %v2634_v57 = vpop.f32.mrb[3].mxu0 }
 0x131   : > { %v771_v58 = vadd.f32 %v2632_v55, %v3405_v53  ;;  %v2635_v59 = vadd.f32 %v2634_v57, %v2633_v56 }
 0x133   : > { %v774_v61 = vadd.f32 %v2635_v59, %v3405_v53  ;;  %v897_v62 = vmax.f32 %v771_v58, 0.0 }
 0x135   : > { %v898_v63 = vmax.f32 %v774_v61, 0.0  ;;  %v2636_v0 = vpop.f32.mrb[4].mxu0 }
 0x136   : > { %v2637_v1 = vpop.f32.mrb[5].mxu0 }
 0x137   : > { %v2638_v2 = vadd.f32 %v2637_v1, %v2636_v0  ;;  %v2639_v3 = vpop.f32.mrb[6].mxu0  ;;  %v929_v4 = vpack.c.bf16 %v898_v63, %v897_v62 }
 0x138   : > { %v2640_v5 = vpop.f32.mrb[7].mxu0 }
 0x139   : > { %v779_v6 = vadd.f32 %v2638_v2, %v3405_v53  ;;  %v2641_v7 = vadd.f32 %v2640_v5, %v2639_v3  ;;  %2788 = vmatprep.mubr.msk.bf16.mxu1 %vm984_vm0, %v929_v4 }
 0x13b   : > { %v782_v8 = vadd.f32 %v2641_v7, %v3405_v53  ;;  %v899_v9 = vmax.f32 %v779_v6, 0.0 }
 0x13d   : > { %v900_v10 = vmax.f32 %v782_v8, 0.0  ;;  %v2642_v11 = vpop.f32.mrb[8].mxu0 }
 0x13e   : > { %v2643_v12 = vpop.f32.mrb[9].mxu0 }
 0x13f   : > { %v930_v13 = vpack.c.bf16 %v900_v10, %v899_v9  ;;  %v2644_v14 = vadd.f32 %v2643_v12, %v2642_v11  ;;  %v2645_v15 = vpop.f32.mrb[10].mxu0 }
 0x140   : > { %v2646_v16 = vpop.f32.mrb[11].mxu0 }
 0x141   : > { %v787_v17 = vadd.f32 %v2644_v14, %v3405_v53  ;;  %v2647_v18 = vadd.f32 %v2646_v16, %v2645_v15  ;;  %2789 = vmatmul.mubr.msk.bf16.vlgmr.msra.gmra.mrb[0].mxu1 %vm984_vm0, %v930_v13 }
 0x142   : > { %2821 = vmatpush3.bf16.msra.mxu1 %v3015_v60 }
 0x143   : > { %v790_v19 = vadd.f32 %v2647_v18, %v3405_v53  ;;  %v901_v20 = vmax.f32 %v787_v17, 0.0 }
 0x145   : > { %v902_v21 = vmax.f32 %v790_v19, 0.0  ;;  %v2648_v22 = vpop.f32.mrb[12].mxu0 }
 0x146   : > { %v2649_v23 = vpop.f32.mrb[13].mxu0 }
 0x147   : > { %v931_v24 = vpack.c.bf16 %v902_v21, %v901_v20  ;;  %v2650_v25 = vadd.f32 %v2649_v23, %v2648_v22  ;;  %v2651_v26 = vpop.f32.mrb[14].mxu0 }
 0x148   : > { %v2652_v27 = vpop.f32.mrb[15].mxu0 }
 0x149   : > { %v795_v28 = vadd.f32 %v2650_v25, %v3405_v53  ;;  %v2653_v29 = vadd.f32 %v2652_v27, %v2651_v26  ;;  %2792 = vmatprep.mubr.msk.bf16.mxu1 %vm984_vm0, %v931_v24 }
 0x14b   : > { %v798_v30 = vadd.f32 %v2653_v29, %v3405_v53  ;;  %v903_v31 = vmax.f32 %v795_v28, 0.0 }
 0x14d   : > { %v904_v32 = vmax.f32 %v798_v30, 0.0  ;;  %v2654_v33 = vpop.f32.mrb[16].mxu0 }
 0x14e   : > { %v2655_v34 = vpop.f32.mrb[17].mxu0 }
 0x14f   : > { %v932_v35 = vpack.c.bf16 %v904_v32, %v903_v31  ;;  %v2656_v36 = vadd.f32 %v2655_v34, %v2654_v33  ;;  %v2657_v37 = vpop.f32.mrb[18].mxu0 }
 0x150   : > { %v2658_v38 = vpop.f32.mrb[19].mxu0 }
 0x151   : > { %v803_v39 = vadd.f32 %v2656_v36, %v3405_v53  ;;  %v2659_v40 = vadd.f32 %v2658_v38, %v2657_v37  ;;  %2793 = vmatmul.mubr.msk.bf16.gmra.mrb[4].mxu1 %vm984_vm0, %v932_v35 }
 0x153   : > { %v806_v41 = vadd.f32 %v2659_v40, %v3405_v53  ;;  %v905_v42 = vmax.f32 %v803_v39, 0.0 }
 0x155   : > { %v906_v43 = vmax.f32 %v806_v41, 0.0  ;;  %v2660_v44 = vpop.f32.mrb[20].mxu0 }
 0x156   : > { %v2661_v45 = vpop.f32.mrb[21].mxu0 }
 0x157   : > { %v933_v46 = vpack.c.bf16 %v906_v43, %v905_v42  ;;  %v2662_v47 = vadd.f32 %v2661_v45, %v2660_v44  ;;  %v2663_v48 = vpop.f32.mrb[22].mxu0 }
 0x158   : > { %v2664_v49 = vpop.f32.mrb[23].mxu0 }
 0x159   : > { %v811_v50 = vadd.f32 %v2662_v47, %v3405_v53  ;;  %v2665_v51 = vadd.f32 %v2664_v49, %v2663_v48  ;;  %2796 = vmatprep.mubr.msk.bf16.mxu1 %vm984_vm0, %v933_v46 }
 0x15b   : > { %v814_v52 = vadd.f32 %v2665_v51, %v3405_v53  ;;  %v907_v54 = vmax.f32 %v811_v50, 0.0 }
 0x15d   : > { %v908_v55 = vmax.f32 %v814_v52, 0.0  ;;  %v2666_v56 = vpop.f32.mrb[24].mxu0 }
 0x15e   : > { %v2667_v57 = vpop.f32.mrb[25].mxu0 }
 0x15f   : > { %v934_v58 = vpack.c.bf16 %v908_v55, %v907_v54  ;;  %v2668_v59 = vadd.f32 %v2667_v57, %v2666_v56  ;;  %v2669_v60 = vpop.f32.mrb[26].mxu0 }
 0x160   : > { %v2670_v61 = vpop.f32.mrb[27].mxu0 }
 0x161   : > { %v819_v62 = vadd.f32 %v2668_v59, %v3405_v53  ;;  %v2671_v63 = vadd.f32 %v2670_v61, %v2669_v60  ;;  %2797 = vmatmul.mubr.msk.bf16.gmra.mrb[8].mxu1 %vm984_vm0, %v934_v58 }
 0x163   : > { %v822_v0 = vadd.f32 %v2671_v63, %v3405_v53  ;;  %v909_v1 = vmax.f32 %v819_v62, 0.0 }
 0x165   : > { %v910_v2 = vmax.f32 %v822_v0, 0.0  ;;  %v2672_v3 = vpop.f32.mrb[28].mxu0 }
 0x166   : > { %v2673_v4 = vpop.f32.mrb[29].mxu0 }
 0x167   : > { %v935_v5 = vpack.c.bf16 %v910_v2, %v909_v1  ;;  %v2674_v6 = vadd.f32 %v2673_v4, %v2672_v3  ;;  %v2675_v7 = vpop.f32.mrb[30].mxu0 }
 0x168   : > { %v2676_v8 = vpop.f32.mrb[31].mxu0 }
 0x169   : > { %v827_v9 = vadd.f32 %v2674_v6, %v3405_v53  ;;  %v2677_v10 = vadd.f32 %v2676_v8, %v2675_v7  ;;  %2800 = vmatprep.mubr.msk.bf16.mxu1 %vm984_vm0, %v935_v5 }
 0x16b   : > { %v830_v11 = vadd.f32 %v2677_v10, %v3405_v53  ;;  %v911_v12 = vmax.f32 %v827_v9, 0.0 }
 0x16d   : > { %v912_v13 = vmax.f32 %v830_v11, 0.0  ;;  %v2678_v14 = vpop.f32.mrb[32].mxu0 }
 0x16e   : > { %v2679_v15 = vpop.f32.mrb[33].mxu0 }
 0x16f   : > { %v936_v16 = vpack.c.bf16 %v912_v13, %v911_v12  ;;  %v2680_v17 = vadd.f32 %v2679_v15, %v2678_v14  ;;  %v2681_v18 = vpop.f32.mrb[34].mxu0 }
 0x170   : > { %v2682_v19 = vpop.f32.mrb[35].mxu0 }
 0x171   : > { %v835_v20 = vadd.f32 %v2680_v17, %v3405_v53  ;;  %v2683_v21 = vadd.f32 %v2682_v19, %v2681_v18  ;;  %2801 = vmatmul.mubr.msk.bf16.gmra.mrb[12].mxu1 %vm984_vm0, %v936_v16 }
 0x173   : > { %v838_v22 = vadd.f32 %v2683_v21, %v3405_v53  ;;  %v913_v23 = vmax.f32 %v835_v20, 0.0 }
 0x175   : > { %v914_v24 = vmax.f32 %v838_v22, 0.0  ;;  %v2684_v25 = vpop.f32.mrb[36].mxu0 }
 0x176   : > { %v2685_v26 = vpop.f32.mrb[37].mxu0 }
 0x177   : > { %v937_v27 = vpack.c.bf16 %v914_v24, %v913_v23  ;;  %v2686_v28 = vadd.f32 %v2685_v26, %v2684_v25  ;;  %v2687_v29 = vpop.f32.mrb[38].mxu0 }
 0x178   : > { %v2688_v30 = vpop.f32.mrb[39].mxu0 }
 0x179   : > { %v843_v31 = vadd.f32 %v2686_v28, %v3405_v53  ;;  %v2689_v32 = vadd.f32 %v2688_v30, %v2687_v29  ;;  %2804 = vmatprep.mubr.msk.bf16.mxu1 %vm984_vm0, %v937_v27 }
 0x17b   : > { %v846_v33 = vadd.f32 %v2689_v32, %v3405_v53  ;;  %v915_v34 = vmax.f32 %v843_v31, 0.0 }
 0x17d   : > { %v916_v35 = vmax.f32 %v846_v33, 0.0  ;;  %v2690_v36 = vpop.f32.mrb[40].mxu0 }
 0x17e   : > { %v2691_v37 = vpop.f32.mrb[41].mxu0 }
 0x17f   : > { %v938_v38 = vpack.c.bf16 %v916_v35, %v915_v34  ;;  %v2692_v39 = vadd.f32 %v2691_v37, %v2690_v36  ;;  %v2693_v40 = vpop.f32.mrb[42].mxu0 }
 0x180   : > { %v2694_v41 = vpop.f32.mrb[43].mxu0 }
 0x181   : > { %v851_v42 = vadd.f32 %v2692_v39, %v3405_v53  ;;  %v2695_v43 = vadd.f32 %v2694_v41, %v2693_v40  ;;  %2805 = vmatmul.mubr.msk.bf16.gmra.mrb[16].mxu1 %vm984_vm0, %v938_v38  ;;  %v3016_v40 = vld [vmem:[%s3825_s7] sm:$0xff]  }
 0x182   : > { %2854 = vmatprep.subr.bf16.mxu1 %v3016_v40  ;;  %v3464_v41 = vld [vmem:[%s3822_s4] ss:$0 sm:$0xff] }
 0x183   : > { %v854_v44 = vadd.f32 %v2695_v43, %v3405_v53  ;;  %v917_v45 = vmax.f32 %v851_v42, 0.0 }
 0x185   : > { %v918_v46 = vmax.f32 %v854_v44, 0.0  ;;  %v2696_v47 = vpop.f32.mrb[44].mxu0 }
 0x186   : > { %v2697_v48 = vpop.f32.mrb[45].mxu0 }
 0x187   : > { %v939_v49 = vpack.c.bf16 %v918_v46, %v917_v45  ;;  %v2698_v50 = vadd.f32 %v2697_v48, %v2696_v47  ;;  %v2699_v51 = vpop.f32.mrb[46].mxu0 }
 0x188   : > { %v2700_v52 = vpop.f32.mrb[47].mxu0 }
 0x189   : > { %v859_v54 = vadd.f32 %v2698_v50, %v3405_v53  ;;  %v2701_v55 = vadd.f32 %v2700_v52, %v2699_v51  ;;  %2808 = vmatprep.mubr.msk.bf16.mxu1 %vm984_vm0, %v939_v49 }
 0x18b   : > { %v862_v56 = vadd.f32 %v2701_v55, %v3405_v53  ;;  %v919_v57 = vmax.f32 %v859_v54, 0.0 }
 0x18d   : > { %v920_v58 = vmax.f32 %v862_v56, 0.0  ;;  %v2702_v59 = vpop.f32.mrb[48].mxu0 }
 0x18e   : > { %v2703_v60 = vpop.f32.mrb[49].mxu0 }
 0x18f   : > { %v940_v61 = vpack.c.bf16 %v920_v58, %v919_v57  ;;  %v2704_v62 = vadd.f32 %v2703_v60, %v2702_v59  ;;  %v2705_v63 = vpop.f32.mrb[50].mxu0 }
 0x190   : > { %v2706_v0 = vpop.f32.mrb[51].mxu0 }
 0x191   : > { %v867_v1 = vadd.f32 %v2704_v62, %v3405_v53  ;;  %v2707_v2 = vadd.f32 %v2706_v0, %v2705_v63  ;;  %2809 = vmatmul.mubr.msk.bf16.gmra.mrb[20].mxu1 %vm984_vm0, %v940_v61 }
 0x193   : > { %v870_v3 = vadd.f32 %v2707_v2, %v3405_v53  ;;  %v921_v4 = vmax.f32 %v867_v1, 0.0 }
 0x195   : > { %v922_v5 = vmax.f32 %v870_v3, 0.0  ;;  %v2708_v6 = vpop.f32.mrb[52].mxu0 }
 0x196   : > { %v2709_v7 = vpop.f32.mrb[53].mxu0 }
 0x197   : > { %v941_v8 = vpack.c.bf16 %v922_v5, %v921_v4  ;;  %v2710_v9 = vadd.f32 %v2709_v7, %v2708_v6  ;;  %v2711_v10 = vpop.f32.mrb[54].mxu0 }
 0x198   : > { %v2712_v11 = vpop.f32.mrb[55].mxu0 }
 0x199   : > { %v875_v12 = vadd.f32 %v2710_v9, %v3405_v53  ;;  %v2713_v13 = vadd.f32 %v2712_v11, %v2711_v10  ;;  %2812 = vmatprep.mubr.msk.bf16.mxu1 %vm984_vm0, %v941_v8 }
 0x19b   : > { %v878_v14 = vadd.f32 %v2713_v13, %v3405_v53  ;;  %v923_v15 = vmax.f32 %v875_v12, 0.0 }
 0x19d   : > { %v924_v16 = vmax.f32 %v878_v14, 0.0  ;;  %v2714_v17 = vpop.f32.mrb[56].mxu0 }
 0x19e   : > { %v2715_v18 = vpop.f32.mrb[57].mxu0 }
 0x19f   : > { %v942_v19 = vpack.c.bf16 %v924_v16, %v923_v15  ;;  %v2716_v20 = vadd.f32 %v2715_v18, %v2714_v17  ;;  %v2717_v21 = vpop.f32.mrb[58].mxu0 }
 0x1a0   : > { %v2718_v22 = vpop.f32.mrb[59].mxu0 }
 0x1a1   : > { %v883_v23 = vadd.f32 %v2716_v20, %v3405_v53  ;;  %v2719_v24 = vadd.f32 %v2718_v22, %v2717_v21  ;;  %2813 = vmatmul.mubr.msk.bf16.gmra.mrb[24].mxu1 %vm984_vm0, %v942_v19 }
 0x1a3   : > { %v886_v25 = vadd.f32 %v2719_v24, %v3405_v53  ;;  %v925_v26 = vmax.f32 %v883_v23, 0.0 }
 0x1a5   : > { %v926_v27 = vmax.f32 %v886_v25, 0.0  ;;  %v2720_v28 = vpop.f32.mrb[60].mxu0 }
 0x1a6   : > { %v2721_v29 = vpop.f32.mrb[61].mxu0 }
 0x1a7   : > { %v943_v30 = vpack.c.bf16 %v926_v27, %v925_v26  ;;  %v2722_v31 = vadd.f32 %v2721_v29, %v2720_v28  ;;  %v2723_v32 = vpop.f32.mrb[62].mxu0 }
 0x1a8   : > { %v2724_v33 = vpop.f32.mrb[63].mxu0 }
 0x1a9   : > { %v891_v34 = vadd.f32 %v2722_v31, %v3405_v53  ;;  %v2725_v35 = vadd.f32 %v2724_v33, %v2723_v32  ;;  %2816 = vmatprep.mubr.msk.bf16.mxu1 %vm984_vm0, %v943_v30 }
 0x1ab   : > { %v894_v36 = vadd.f32 %v2725_v35, %v3405_v53  ;;  %v927_v37 = vmax.f32 %v891_v34, 0.0 }
 0x1ad   : > { %v928_v38 = vmax.f32 %v894_v36, 0.0 }
 0x1af   : > { %v944_v39 = vpack.c.bf16 %v928_v38, %v927_v37 }
 0x1b1   : > { %2817 = vmatmul.mubr.msk.bf16.gmra.mrb[28].mxu1 %vm984_vm0, %v944_v39 }
 0x214   : > { %v2790_v42 = vpop.f32.mrb[0].mxu1 }
 0x215   : > { %v1076_v43 = vadd.f32 %v2790_v42, %v3464_v41  ;;  %v1067_v44 = vpop.f32.mrb[1].mxu1 }
 0x216   : > { %v1068_v53 = vadd.f32 %v3464_v41, %v1067_v44  ;;  %v2791_v45 = vpop.f32.mrb[2].mxu1 }
 0x217   : > { %v1079_v46 = vadd.f32 %v2791_v45, %v3464_v41  ;;  %v1070_v47 = vpop.f32.mrb[3].mxu1  ;;  %v1196_v49 = vmax.f32 %v1076_v43, 0.0 }
 0x218   : > { %v1071_v48 = vadd.f32 %v3464_v41, %v1070_v47  ;;  %v1194_v51 = vmax.f32 %v1068_v53, 0.0 }
 0x219   : > { %v1197_v50 = vmax.f32 %v1079_v46, 0.0 }
 0x21a   : > { %v1195_v52 = vmax.f32 %v1071_v48, 0.0 }
 0x21b   : > { %v1227_v54 = vpack.c.bf16 %v1197_v50, %v1196_v49 }
 0x21c   : > { %v1226_v55 = vpack.c.bf16 %v1195_v52, %v1194_v51 }
 0x21e   : > { %2822 = vmatprep.mubr.msk.bf16.mxu1 %vm1257_vm1, %v1226_v55 }
 0x21f   : > { %2823 = vmatmul.mubr.msk.bf16.vlgmr.msra.gmra.mrb[32].mxu1 %vm1257_vm1, %v1227_v54 }
 0x220   : > { %2855 = vmatpush3.bf16.msra.mxu1 %v3016_v40 }
 0x224   : > { %v2794_v56 = vpop.f32.mrb[4].mxu1 }
 0x225   : > { %v1092_v57 = vadd.f32 %v2794_v56, %v3464_v41  ;;  %v1083_v58 = vpop.f32.mrb[5].mxu1 }
 0x226   : > { %v1084_v59 = vadd.f32 %v3464_v41, %v1083_v58  ;;  %v2795_v60 = vpop.f32.mrb[6].mxu1 }
 0x227   : > { %v1095_v61 = vadd.f32 %v2795_v60, %v3464_v41  ;;  %v1086_v62 = vpop.f32.mrb[7].mxu1  ;;  %v1200_v0 = vmax.f32 %v1092_v57, 0.0 }
 0x228   : > { %v1087_v63 = vadd.f32 %v3464_v41, %v1086_v62  ;;  %v1198_v2 = vmax.f32 %v1084_v59, 0.0 }
 0x229   : > { %v1201_v1 = vmax.f32 %v1095_v61, 0.0 }
 0x22a   : > { %v1199_v3 = vmax.f32 %v1087_v63, 0.0 }
 0x22b   : > { %v1229_v4 = vpack.c.bf16 %v1201_v1, %v1200_v0 }
 0x22c   : > { %v1228_v5 = vpack.c.bf16 %v1199_v3, %v1198_v2 }
 0x22e   : > { %2826 = vmatprep.mubr.msk.bf16.mxu1 %vm1257_vm1, %v1228_v5 }
 0x22f   : > { %2827 = vmatmul.mubr.msk.bf16.gmra.mrb[36].mxu1 %vm1257_vm1, %v1229_v4 }
 0x234   : > { %v2798_v6 = vpop.f32.mrb[8].mxu1 }
 0x235   : > { %v1108_v7 = vadd.f32 %v2798_v6, %v3464_v41  ;;  %v1099_v8 = vpop.f32.mrb[9].mxu1 }
 0x236   : > { %v1100_v9 = vadd.f32 %v3464_v41, %v1099_v8  ;;  %v2799_v10 = vpop.f32.mrb[10].mxu1 }
 0x237   : > { %v1111_v11 = vadd.f32 %v2799_v10, %v3464_v41  ;;  %v1102_v12 = vpop.f32.mrb[11].mxu1  ;;  %v1204_v14 = vmax.f32 %v1108_v7, 0.0 }
 0x238   : > { %v1103_v13 = vadd.f32 %v3464_v41, %v1102_v12  ;;  %v1202_v16 = vmax.f32 %v1100_v9, 0.0 }
 0x239   : > { %v1205_v15 = vmax.f32 %v1111_v11, 0.0 }
 0x23a   : > { %v1203_v17 = vmax.f32 %v1103_v13, 0.0 }
 0x23b   : > { %v1231_v18 = vpack.c.bf16 %v1205_v15, %v1204_v14 }
 0x23c   : > { %v1230_v19 = vpack.c.bf16 %v1203_v17, %v1202_v16 }
 0x23e   : > { %2830 = vmatprep.mubr.msk.bf16.mxu1 %vm1257_vm1, %v1230_v19 }
 0x23f   : > { %2831 = vmatmul.mubr.msk.bf16.gmra.mrb[40].mxu1 %vm1257_vm1, %v1231_v18 }
 0x244   : > { %v2802_v20 = vpop.f32.mrb[12].mxu1 }
 0x245   : > { %v1124_v21 = vadd.f32 %v2802_v20, %v3464_v41  ;;  %v1115_v22 = vpop.f32.mrb[13].mxu1 }
 0x246   : > { %v1116_v23 = vadd.f32 %v3464_v41, %v1115_v22  ;;  %v2803_v24 = vpop.f32.mrb[14].mxu1 }
 0x247   : > { %v1127_v25 = vadd.f32 %v2803_v24, %v3464_v41  ;;  %v1118_v26 = vpop.f32.mrb[15].mxu1  ;;  %v1208_v28 = vmax.f32 %v1124_v21, 0.0 }
 0x248   : > { %v1119_v27 = vadd.f32 %v3464_v41, %v1118_v26  ;;  %v1206_v30 = vmax.f32 %v1116_v23, 0.0 }
 0x249   : > { %v1209_v29 = vmax.f32 %v1127_v25, 0.0 }
 0x24a   : > { %v1207_v31 = vmax.f32 %v1119_v27, 0.0  ;;  %v3017_v27 = vld [vmem:[%s3827_s9] ss:$8 sps:$4 sm:$0xff]  }
 0x24b   : > { %v1233_v32 = vpack.c.bf16 %v1209_v29, %v1208_v28  ;;  %v3019_v28 = vld [vmem:[%s3827_s9 + $0x4] ss:$8 sps:$4 sm:$0xff]   ;;  %v3526_v29 = vld [vmem:[%s3824_s6] ss:$0 sm:$0xff] }
 0x24c   : > { %v1232_v33 = vpack.c.bf16 %v1207_v31, %v1206_v30  ;;  %1895 = vmatprep.subr.bf16.mxu0 %v3019_v28  ;;  %2888 = vmatprep.subr.bf16.mxu1 %v3019_v28  ;;  %v3020_v30 = vld [vmem:[%s3827_s9 + $0x10] ss:$8 sps:$4 sm:$0xff]   ;;  %v3025_v31 = vld [vmem:[%s3827_s9 + $0x24] ss:$8 sps:$4 sm:$0xff]  }
 0x24d   : > { %1896 = vmatpush1.bf16.msra.mxu0 %v3017_v27 }
 0x24e   : > { %2834 = vmatprep.mubr.msk.bf16.mxu1 %vm1257_vm1, %v1232_v33 }
 0x24f   : > { %2835 = vmatmul.mubr.msk.bf16.gmra.mrb[44].mxu1 %vm1257_vm1, %v1233_v32 }
 0x254   : > { %v2806_v34 = vpop.f32.mrb[16].mxu1 }
 0x255   : > { %v1140_v35 = vadd.f32 %v2806_v34, %v3464_v41  ;;  %v1131_v36 = vpop.f32.mrb[17].mxu1 }
 0x256   : > { %v1132_v37 = vadd.f32 %v3464_v41, %v1131_v36  ;;  %v2807_v38 = vpop.f32.mrb[18].mxu1 }
 0x257   : > { %v1143_v39 = vadd.f32 %v2807_v38, %v3464_v41  ;;  %v1134_v40 = vpop.f32.mrb[19].mxu1  ;;  %v1212_v43 = vmax.f32 %v1140_v35, 0.0 }
 0x258   : > { %v1135_v42 = vadd.f32 %v3464_v41, %v1134_v40  ;;  %v1210_v53 = vmax.f32 %v1132_v37, 0.0  ;;  %v3023_v37 = vld [vmem:[%s3827_s9 + $0x20] ss:$8 sps:$4 sm:$0xff]  }
 0x259   : > { %v1213_v44 = vmax.f32 %v1143_v39, 0.0 }
 0x25a   : > { %v1211_v45 = vmax.f32 %v1135_v42, 0.0 }
 0x25b   : > { %v1235_v46 = vpack.c.bf16 %v1213_v44, %v1212_v43 }
 0x25c   : > { %v1234_v47 = vpack.c.bf16 %v1211_v45, %v1210_v53 }
 0x25e   : > { %2838 = vmatprep.mubr.msk.bf16.mxu1 %vm1257_vm1, %v1234_v47 }
 0x25f   : > { %2839 = vmatmul.mubr.msk.bf16.gmra.mrb[48].mxu1 %vm1257_vm1, %v1235_v46 }
 0x264   : > { %v2810_v48 = vpop.f32.mrb[20].mxu1 }
 0x265   : > { %v1156_v49 = vadd.f32 %v2810_v48, %v3464_v41  ;;  %v1147_v50 = vpop.f32.mrb[21].mxu1 }
 0x266   : > { %v1148_v51 = vadd.f32 %v3464_v41, %v1147_v50  ;;  %v2811_v52 = vpop.f32.mrb[22].mxu1 }
 0x267   : > { %v1159_v54 = vadd.f32 %v2811_v52, %v3464_v41  ;;  %v1150_v55 = vpop.f32.mrb[23].mxu1  ;;  %v1216_v57 = vmax.f32 %v1156_v49, 0.0 }
 0x268   : > { %v1151_v56 = vadd.f32 %v3464_v41, %v1150_v55  ;;  %v1214_v59 = vmax.f32 %v1148_v51, 0.0 }
 0x269   : > { %v1217_v58 = vmax.f32 %v1159_v54, 0.0 }
 0x26a   : > { %v1215_v60 = vmax.f32 %v1151_v56, 0.0 }
 0x26b   : > { %v1237_v61 = vpack.c.bf16 %v1217_v58, %v1216_v57 }
 0x26c   : > { %v1236_v62 = vpack.c.bf16 %v1215_v60, %v1214_v59 }
 0x26e   : > { %2842 = vmatprep.mubr.msk.bf16.mxu1 %vm1257_vm1, %v1236_v62 }
 0x26f   : > { %2843 = vmatmul.mubr.msk.bf16.gmra.mrb[52].mxu1 %vm1257_vm1, %v1237_v61 }
 0x274   : > { %v2814_v63 = vpop.f32.mrb[24].mxu1 }
 0x275   : > { %v1172_v0 = vadd.f32 %v2814_v63, %v3464_v41  ;;  %v1163_v1 = vpop.f32.mrb[25].mxu1 }
 0x276   : > { %v1164_v2 = vadd.f32 %v3464_v41, %v1163_v1  ;;  %v2815_v3 = vpop.f32.mrb[26].mxu1 }
 0x277   : > { %v1175_v4 = vadd.f32 %v2815_v3, %v3464_v41  ;;  %v1166_v5 = vpop.f32.mrb[27].mxu1  ;;  %v1220_v7 = vmax.f32 %v1172_v0, 0.0 }
 0x278   : > { %v1167_v6 = vadd.f32 %v3464_v41, %v1166_v5  ;;  %v1218_v9 = vmax.f32 %v1164_v2, 0.0 }
 0x279   : > { %v1221_v8 = vmax.f32 %v1175_v4, 0.0 }
 0x27a   : > { %v1219_v10 = vmax.f32 %v1167_v6, 0.0 }
 0x27b   : > { %v1239_v11 = vpack.c.bf16 %v1221_v8, %v1220_v7 }
 0x27c   : > { %v1238_v12 = vpack.c.bf16 %v1219_v10, %v1218_v9 }
 0x27e   : > { %2846 = vmatprep.mubr.msk.bf16.mxu1 %vm1257_vm1, %v1238_v12 }
 0x27f   : > { %2847 = vmatmul.mubr.msk.bf16.gmra.mrb[56].mxu1 %vm1257_vm1, %v1239_v11 }
 0x284   : > { %v2818_v13 = vpop.f32.mrb[28].mxu1 }
 0x285   : > { %v1188_v14 = vadd.f32 %v2818_v13, %v3464_v41  ;;  %v1179_v15 = vpop.f32.mrb[29].mxu1 }
 0x286   : > { %v1180_v16 = vadd.f32 %v3464_v41, %v1179_v15  ;;  %v2819_v17 = vpop.f32.mrb[30].mxu1 }
 0x287   : > { %v1191_v18 = vadd.f32 %v2819_v17, %v3464_v41  ;;  %v1182_v19 = vpop.f32.mrb[31].mxu1  ;;  %v1224_v21 = vmax.f32 %v1188_v14, 0.0 }
 0x288   : > { %v1183_v20 = vadd.f32 %v3464_v41, %v1182_v19  ;;  %v1222_v23 = vmax.f32 %v1180_v16, 0.0  ;;  %v3022_v41 = vld [vmem:[%s3827_s9 + $0x14] ss:$8 sps:$4 sm:$0xff]  }
 0x289   : > { %v1225_v22 = vmax.f32 %v1191_v18, 0.0  ;;  %1897 = vmatprep.subr.bf16.mxu0 %v3022_v41 }
 0x28a   : > { %v1223_v24 = vmax.f32 %v1183_v20, 0.0  ;;  %1898 = vmatpush1.bf16.msra.mxu0 %v3020_v30 }
 0x28b   : > { %v1241_v25 = vpack.c.bf16 %v1225_v22, %v1224_v21  ;;  %1899 = vmatprep.subr.bf16.mxu0 %v3025_v31 }
 0x28c   : > { %v1240_v26 = vpack.c.bf16 %v1223_v24, %v1222_v23 }
 0x28e   : > { %2850 = vmatprep.mubr.msk.bf16.mxu1 %vm1257_vm1, %v1240_v26  ;;  %1900 = vmatpush1.bf16.msra.mxu0 %v3023_v37 }
 0x28f   : > { %2851 = vmatmul.mubr.msk.bf16.gmra.mrb[60].mxu1 %vm1257_vm1, %v1241_v25 }
 0x2f2   : > { %v2824_v32 = vpop.f32.mrb[32].mxu1 }
 0x2f3   : > { %v1349_v33 = vadd.f32 %v2824_v32, %v3526_v29  ;;  %v1340_v34 = vpop.f32.mrb[33].mxu1 }
 0x2f4   : > { %v1341_v35 = vadd.f32 %v3526_v29, %v1340_v34  ;;  %v2825_v36 = vpop.f32.mrb[34].mxu1 }
 0x2f5   : > { %v1352_v38 = vadd.f32 %v2825_v36, %v3526_v29  ;;  %v1343_v39 = vpop.f32.mrb[35].mxu1  ;;  %v1469_v42 = vmax.f32 %v1349_v33, 0.0 }
 0x2f6   : > { %v1344_v40 = vadd.f32 %v3526_v29, %v1343_v39  ;;  %v1467_v44 = vmax.f32 %v1341_v35, 0.0 }
 0x2f7   : > { %v1470_v43 = vmax.f32 %v1352_v38, 0.0 }
 0x2f8   : > { %v1468_v53 = vmax.f32 %v1344_v40, 0.0 }
 0x2f9   : > { %v1500_v45 = vpack.c.bf16 %v1470_v43, %v1469_v42 }
 0x2fa   : > { %v1499_v46 = vpack.c.bf16 %v1468_v53, %v1467_v44 }
 0x2fc   : > { %2856 = vmatprep.mubr.msk.bf16.mxu1 %vm1257_vm1, %v1499_v46 }
 0x2fd   : > { %2857 = vmatmul.mubr.msk.bf16.vlgmr.msra.gmra.mrb[64].mxu1 %vm1257_vm1, %v1500_v45 }
 0x2fe   : > { %2892 = vmatpush1.bf16.msra.mxu1 %v3017_v27 }
 0x2ff   : > { %2889 = vmatprep.subr.bf16.mxu1 %v3022_v41 }
 0x302   : > { %v2828_v47 = vpop.f32.mrb[36].mxu1  ;;  %2893 = vmatpush1.bf16.msra.mxu1 %v3020_v30 }
 0x303   : > { %v1365_v48 = vadd.f32 %v2828_v47, %v3526_v29  ;;  %v1356_v49 = vpop.f32.mrb[37].mxu1  ;;  %2890 = vmatprep.subr.bf16.mxu1 %v3025_v31 }
 0x304   : > { %v1357_v50 = vadd.f32 %v3526_v29, %v1356_v49  ;;  %v2829_v51 = vpop.f32.mrb[38].mxu1 }
 0x305   : > { %v1368_v52 = vadd.f32 %v2829_v51, %v3526_v29  ;;  %v1359_v54 = vpop.f32.mrb[39].mxu1  ;;  %v1473_v56 = vmax.f32 %v1365_v48, 0.0 }
 0x306   : > { %v1360_v55 = vadd.f32 %v3526_v29, %v1359_v54  ;;  %2894 = vmatpush1.bf16.msra.mxu1 %v3023_v37  ;;  %v1471_v58 = vmax.f32 %v1357_v50, 0.0 }
 0x307   : > { %v1474_v57 = vmax.f32 %v1368_v52, 0.0 }
 0x308   : > { %v1472_v59 = vmax.f32 %v1360_v55, 0.0 }
 0x309   : > { %v1502_v60 = vpack.c.bf16 %v1474_v57, %v1473_v56 }
 0x30a   : > { %v1501_v61 = vpack.c.bf16 %v1472_v59, %v1471_v58 }
 0x30c   : > { %2860 = vmatprep.mubr.msk.bf16.mxu1 %vm1257_vm1, %v1501_v61 }
 0x30d   : > { %2861 = vmatmul.mubr.msk.bf16.gmra.mrb[68].mxu1 %vm1257_vm1, %v1502_v60  ;;  %v3028_v60 = vld [vmem:[%s3827_s9 + $0x34] ss:$8 sps:$4 sm:$0xff]  }
 0x30e   : > { %1901 = vmatprep.subr.bf16.mxu0 %v3028_v60  ;;  %2891 = vmatprep.subr.bf16.mxu1 %v3028_v60 }
 0x312   : > { %v2832_v62 = vpop.f32.mrb[40].mxu1 }
 0x313   : > { %v1381_v63 = vadd.f32 %v2832_v62, %v3526_v29  ;;  %v1372_v0 = vpop.f32.mrb[41].mxu1 }
 0x314   : > { %v1373_v1 = vadd.f32 %v3526_v29, %v1372_v0  ;;  %v2833_v2 = vpop.f32.mrb[42].mxu1 }
 0x315   : > { %v1384_v3 = vadd.f32 %v2833_v2, %v3526_v29  ;;  %v1375_v4 = vpop.f32.mrb[43].mxu1  ;;  %v1477_v6 = vmax.f32 %v1381_v63, 0.0  ;;  %v3026_v63 = vld [vmem:[%s3827_s9 + $0x30] ss:$8 sps:$4 sm:$0xff]  }
 0x316   : > { %v1376_v5 = vadd.f32 %v3526_v29, %v1375_v4  ;;  %v1475_v8 = vmax.f32 %v1373_v1, 0.0  ;;  %1902 = vmatpush1.bf16.msra.mxu0 %v3026_v63  ;;  %2895 = vmatpush1.bf16.msra.mxu1 %v3026_v63 }
 0x317   : > { %v1478_v7 = vmax.f32 %v1384_v3, 0.0 }
 0x318   : > { %v1476_v9 = vmax.f32 %v1376_v5, 0.0 }
 0x319   : > { %v1504_v10 = vpack.c.bf16 %v1478_v7, %v1477_v6  ;;  %v3130_v6 = vmov 0  }
 0x31a   : > { %v1503_v11 = vpack.c.bf16 %v1476_v9, %v1475_v8  ;;  %1927 = vmatprep.mubr.bf16.mxu0 %v3130_v6 }
 0x31c   : > { %2864 = vmatprep.mubr.msk.bf16.mxu1 %vm1257_vm1, %v1503_v11 }
 0x31d   : > { %2865 = vmatmul.mubr.msk.bf16.gmra.mrb[72].mxu1 %vm1257_vm1, %v1504_v10 }
 0x322   : > { %v2836_v12 = vpop.f32.mrb[44].mxu1 }
 0x323   : > { %v1397_v13 = vadd.f32 %v2836_v12, %v3526_v29  ;;  %v1388_v14 = vpop.f32.mrb[45].mxu1 }
 0x324   : > { %v1389_v15 = vadd.f32 %v3526_v29, %v1388_v14  ;;  %v2837_v16 = vpop.f32.mrb[46].mxu1 }
 0x325   : > { %v1400_v17 = vadd.f32 %v2837_v16, %v3526_v29  ;;  %v1391_v18 = vpop.f32.mrb[47].mxu1  ;;  %v1481_v20 = vmax.f32 %v1397_v13, 0.0 }
 0x326   : > { %v1392_v19 = vadd.f32 %v3526_v29, %v1391_v18  ;;  %v1479_v22 = vmax.f32 %v1389_v15, 0.0 }
 0x327   : > { %v1482_v21 = vmax.f32 %v1400_v17, 0.0 }
 0x328   : > { %v1480_v23 = vmax.f32 %v1392_v19, 0.0 }
 0x329   : > { %v1506_v24 = vpack.c.bf16 %v1482_v21, %v1481_v20 }
 0x32a   : > { %v1505_v25 = vpack.c.bf16 %v1480_v23, %v1479_v22  ;;  %v3596_v22 = vld [vmem:[%s3826_s8] ss:$0 sm:$0xff] }
 0x32c   : > { %2868 = vmatprep.mubr.msk.bf16.mxu1 %vm1257_vm1, %v1505_v25 }
 0x32d   : > { %2869 = vmatmul.mubr.msk.bf16.gmra.mrb[76].mxu1 %vm1257_vm1, %v1506_v24 }
 0x332   : > { %v2840_v26 = vpop.f32.mrb[48].mxu1 }
 0x333   : > { %v1413_v27 = vadd.f32 %v2840_v26, %v3526_v29  ;;  %v1404_v28 = vpop.f32.mrb[49].mxu1 }
 0x334   : > { %v1405_v41 = vadd.f32 %v3526_v29, %v1404_v28  ;;  %v2841_v30 = vpop.f32.mrb[50].mxu1 }
 0x335   : > { %v1416_v31 = vadd.f32 %v2841_v30, %v3526_v29  ;;  %v1407_v32 = vpop.f32.mrb[51].mxu1  ;;  %v1485_v34 = vmax.f32 %v1413_v27, 0.0 }
 0x336   : > { %v1408_v33 = vadd.f32 %v3526_v29, %v1407_v32  ;;  %v1483_v36 = vmax.f32 %v1405_v41, 0.0 }
 0x337   : > { %v1486_v35 = vmax.f32 %v1416_v31, 0.0 }
 0x338   : > { %v1484_v37 = vmax.f32 %v1408_v33, 0.0 }
 0x339   : > { %v1508_v38 = vpack.c.bf16 %v1486_v35, %v1485_v34 }
 0x33a   : > { %v1507_v39 = vpack.c.bf16 %v1484_v37, %v1483_v36 }
 0x33c   : > { %2872 = vmatprep.mubr.msk.bf16.mxu1 %vm1257_vm1, %v1507_v39 }
 0x33d   : > { %2873 = vmatmul.mubr.msk.bf16.gmra.mrb[80].mxu1 %vm1257_vm1, %v1508_v38 }
 0x342   : > { %v2844_v40 = vpop.f32.mrb[52].mxu1 }
 0x343   : > { %v1429_v42 = vadd.f32 %v2844_v40, %v3526_v29  ;;  %v1420_v43 = vpop.f32.mrb[53].mxu1 }
 0x344   : > { %v1421_v44 = vadd.f32 %v3526_v29, %v1420_v43  ;;  %v2845_v53 = vpop.f32.mrb[54].mxu1 }
 0x345   : > { %v1432_v45 = vadd.f32 %v2845_v53, %v3526_v29  ;;  %v1423_v46 = vpop.f32.mrb[55].mxu1  ;;  %v1489_v48 = vmax.f32 %v1429_v42, 0.0 }
 0x346   : > { %v1424_v47 = vadd.f32 %v3526_v29, %v1423_v46  ;;  %v1487_v50 = vmax.f32 %v1421_v44, 0.0 }
 0x347   : > { %v1490_v49 = vmax.f32 %v1432_v45, 0.0 }
 0x348   : > { %v1488_v51 = vmax.f32 %v1424_v47, 0.0 }
 0x349   : > { %v1510_v52 = vpack.c.bf16 %v1490_v49, %v1489_v48 }
 0x34a   : > { %v1509_v54 = vpack.c.bf16 %v1488_v51, %v1487_v50 }
 0x34c   : > { %2876 = vmatprep.mubr.msk.bf16.mxu1 %vm1257_vm1, %v1509_v54 }
 0x34d   : > { %2877 = vmatmul.mubr.msk.bf16.gmra.mrb[84].mxu1 %vm1257_vm1, %v1510_v52 }
 0x352   : > { %v2848_v55 = vpop.f32.mrb[56].mxu1 }
 0x353   : > { %v1445_v56 = vadd.f32 %v2848_v55, %v3526_v29  ;;  %v1436_v57 = vpop.f32.mrb[57].mxu1 }
 0x354   : > { %v1437_v58 = vadd.f32 %v3526_v29, %v1436_v57  ;;  %v2849_v59 = vpop.f32.mrb[58].mxu1 }
 0x355   : > { %v1448_v61 = vadd.f32 %v2849_v59, %v3526_v29  ;;  %v1439_v62 = vpop.f32.mrb[59].mxu1  ;;  %v1493_v1 = vmax.f32 %v1445_v56, 0.0 }
 0x356   : > { %v1440_v0 = vadd.f32 %v3526_v29, %v1439_v62  ;;  %v1491_v3 = vmax.f32 %v1437_v58, 0.0 }
 0x357   : > { %v1494_v2 = vmax.f32 %v1448_v61, 0.0 }
 0x358   : > { %v1492_v4 = vmax.f32 %v1440_v0, 0.0 }
 0x359   : > { %v1512_v5 = vpack.c.bf16 %v1494_v2, %v1493_v1 }
 0x35a   : > { %v1511_v7 = vpack.c.bf16 %v1492_v4, %v1491_v3 }
 0x35c   : > { %2880 = vmatprep.mubr.msk.bf16.mxu1 %vm1257_vm1, %v1511_v7 }
 0x35d   : > { %2881 = vmatmul.mubr.msk.bf16.gmra.mrb[88].mxu1 %vm1257_vm1, %v1512_v5 }
 0x362   : > { %v2852_v8 = vpop.f32.mrb[60].mxu1 }
 0x363   : > { %v1461_v9 = vadd.f32 %v2852_v8, %v3526_v29  ;;  %v1452_v10 = vpop.f32.mrb[61].mxu1 }
 0x364   : > { %v1453_v11 = vadd.f32 %v3526_v29, %v1452_v10  ;;  %v2853_v12 = vpop.f32.mrb[62].mxu1 }
 0x365   : > { %v1464_v13 = vadd.f32 %v2853_v12, %v3526_v29  ;;  %v1455_v14 = vpop.f32.mrb[63].mxu1  ;;  %v1497_v16 = vmax.f32 %v1461_v9, 0.0 }
 0x366   : > { %v1456_v15 = vadd.f32 %v3526_v29, %v1455_v14  ;;  %v1495_v18 = vmax.f32 %v1453_v11, 0.0 }
 0x367   : > { %v1498_v17 = vmax.f32 %v1464_v13, 0.0 }
 0x368   : > { %v1496_v19 = vmax.f32 %v1456_v15, 0.0 }
 0x369   : > { %v1514_v20 = vpack.c.bf16 %v1498_v17, %v1497_v16 }
 0x36a   : > { %v1513_v21 = vpack.c.bf16 %v1496_v19, %v1495_v18 }
 0x36c   : > { %2884 = vmatprep.mubr.msk.bf16.mxu1 %vm1257_vm1, %v1513_v21 }
 0x36d   : > { %2885 = vmatmul.mubr.msk.bf16.gmra.mrb[92].mxu1 %vm1257_vm1, %v1514_v20 }
 0x36e   : > { %2037 = vmatprep.mubr.bf16.mxu1 %v3130_v6 }
 0x3d0   : > { %v2858_v23 = vpop.f32.mrb[64].mxu1 }
 0x3d1   : > { %v1621_v29 = vadd.f32 %v2858_v23, %v3596_v22  ;;  %v1612_v24 = vpop.f32.mrb[65].mxu1 }
 0x3d2   : > { %v1613_v25 = vadd.f32 %v3596_v22, %v1612_v24  ;;  %v2859_v26 = vpop.f32.mrb[66].mxu1 }
 0x3d3   : > { %v1624_v27 = vadd.f32 %v2859_v26, %v3596_v22  ;;  %v1615_v28 = vpop.f32.mrb[67].mxu1  ;;  %v1741_v30 = vmax.f32 %v1621_v29, 0.0 }
 0x3d4   : > { %v1616_v41 = vadd.f32 %v3596_v22, %v1615_v28  ;;  %v1739_v32 = vmax.f32 %v1613_v25, 0.0 }
 0x3d5   : > { %v1742_v31 = vmax.f32 %v1624_v27, 0.0 }
 0x3d6   : > { %v1740_v33 = vmax.f32 %v1616_v41, 0.0 }
 0x3d7   : > { %v1772_v34 = vpack.c.bf16 %v1742_v31, %v1741_v30 }
 0x3d8   : > { %v1771_v35 = vpack.c.bf16 %v1740_v33, %v1739_v32 }
 0x3da   : > { %2524 = vmatmul.mubr.msk.bf16.vlgmr.msra.gmra.mrb[64].mxu0 %vm984_vm0, %v1771_v35 }
 0x3db   : > { %1937 = vmatprep.mubr.bf16.mxu0 %v3130_v6 }
 0x3e0   : > { %v2862_v36 = vpop.f32.mrb[68].mxu1 }
 0x3e1   : > { %v1637_v37 = vadd.f32 %v2862_v36, %v3596_v22  ;;  %v1628_v38 = vpop.f32.mrb[69].mxu1 }
 0x3e2   : > { %v1629_v39 = vadd.f32 %v3596_v22, %v1628_v38  ;;  %v2863_v40 = vpop.f32.mrb[70].mxu1  ;;  %2525 = vmatmul.mubr.msk.bf16.gmra.mrb[68].mxu0 %vm984_vm0, %v1772_v34 }
 0x3e3   : > { %v1640_v42 = vadd.f32 %v2863_v40, %v3596_v22  ;;  %v1631_v43 = vpop.f32.mrb[71].mxu1  ;;  %1947 = vmatprep.mubr.bf16.mxu0 %v3130_v6  ;;  %v1745_v53 = vmax.f32 %v1637_v37, 0.0 }
 0x3e4   : > { %v1632_v44 = vadd.f32 %v3596_v22, %v1631_v43  ;;  %v1743_v46 = vmax.f32 %v1629_v39, 0.0 }
 0x3e5   : > { %v1746_v45 = vmax.f32 %v1640_v42, 0.0 }
 0x3e6   : > { %v1744_v47 = vmax.f32 %v1632_v44, 0.0 }
 0x3e7   : > { %v1774_v48 = vpack.c.bf16 %v1746_v45, %v1745_v53 }
 0x3e8   : > { %v1773_v49 = vpack.c.bf16 %v1744_v47, %v1743_v46 }
 0x3ea   : > { %2526 = vmatmul.mubr.msk.bf16.gmra.mrb[72].mxu0 %vm984_vm0, %v1773_v49 }
 0x3eb   : > { %1957 = vmatprep.mubr.bf16.mxu0 %v3130_v6 }
 0x3f0   : > { %v2866_v50 = vpop.f32.mrb[72].mxu1 }
 0x3f1   : > { %v1653_v51 = vadd.f32 %v2866_v50, %v3596_v22  ;;  %v1644_v52 = vpop.f32.mrb[73].mxu1 }
 0x3f2   : > { %v1645_v54 = vadd.f32 %v3596_v22, %v1644_v52  ;;  %v2867_v55 = vpop.f32.mrb[74].mxu1  ;;  %2527 = vmatmul.mubr.msk.bf16.gmra.mrb[76].mxu0 %vm984_vm0, %v1774_v48 }
 0x3f3   : > { %v1656_v56 = vadd.f32 %v2867_v55, %v3596_v22  ;;  %v1647_v57 = vpop.f32.mrb[75].mxu1  ;;  %1967 = vmatprep.mubr.bf16.mxu0 %v3130_v6  ;;  %v1749_v59 = vmax.f32 %v1653_v51, 0.0 }
 0x3f4   : > { %v1648_v58 = vadd.f32 %v3596_v22, %v1647_v57  ;;  %v1747_v61 = vmax.f32 %v1645_v54, 0.0 }
 0x3f5   : > { %v1750_v60 = vmax.f32 %v1656_v56, 0.0 }
 0x3f6   : > { %v1748_v62 = vmax.f32 %v1648_v58, 0.0 }
 0x3f7   : > { %v1776_v63 = vpack.c.bf16 %v1750_v60, %v1749_v59 }
 0x3f8   : > { %v1775_v0 = vpack.c.bf16 %v1748_v62, %v1747_v61 }
 0x3fa   : > { %2528 = vmatmul.mubr.msk.bf16.gmra.mrb[80].mxu0 %vm984_vm0, %v1775_v0 }
 0x3fb   : > { %1977 = vmatprep.mubr.bf16.mxu0 %v3130_v6 }
 0x400   : > { %v2870_v1 = vpop.f32.mrb[76].mxu1 }
 0x401   : > { %v1669_v2 = vadd.f32 %v2870_v1, %v3596_v22  ;;  %v1660_v3 = vpop.f32.mrb[77].mxu1 }
 0x402   : > { %v1661_v4 = vadd.f32 %v3596_v22, %v1660_v3  ;;  %v2871_v5 = vpop.f32.mrb[78].mxu1  ;;  %2529 = vmatmul.mubr.msk.bf16.gmra.mrb[84].mxu0 %vm984_vm0, %v1776_v63 }
 0x403   : > { %v1672_v7 = vadd.f32 %v2871_v5, %v3596_v22  ;;  %v1663_v8 = vpop.f32.mrb[79].mxu1  ;;  %1987 = vmatprep.mubr.bf16.mxu0 %v3130_v6  ;;  %v1753_v10 = vmax.f32 %v1669_v2, 0.0 }
 0x404   : > { %v1664_v9 = vadd.f32 %v3596_v22, %v1663_v8  ;;  %v1751_v12 = vmax.f32 %v1661_v4, 0.0 }
 0x405   : > { %v1754_v11 = vmax.f32 %v1672_v7, 0.0 }
 0x406   : > { %v1752_v13 = vmax.f32 %v1664_v9, 0.0 }
 0x407   : > { %v1778_v14 = vpack.c.bf16 %v1754_v11, %v1753_v10  ;;  %v1797_v10 = vlaneseq }
 0x408   : > { %v1777_v15 = vpack.c.bf16 %v1752_v13, %v1751_v12 }
 0x409   : > { %v1798_v11 = vshrl.u32 %v1797_v10, 7 }
 0x40a   : > { %2530 = vmatmul.mubr.msk.bf16.gmra.mrb[88].mxu0 %vm984_vm0, %v1777_v15 }
 0x40b   : > { %1997 = vmatprep.mubr.bf16.mxu0 %v3130_v6  ;;  %v1799_v12 = vsub.s32 0, %v1798_v11  ;;  %v1803_v13 = vsub.s32 1, %v1798_v11 }
 0x410   : > { %v2874_v16 = vpop.f32.mrb[80].mxu1 }
 0x411   : > { %v1685_v17 = vadd.f32 %v2874_v16, %v3596_v22  ;;  %v1676_v18 = vpop.f32.mrb[81].mxu1 }
 0x412   : > { %v1677_v19 = vadd.f32 %v3596_v22, %v1676_v18  ;;  %v2875_v20 = vpop.f32.mrb[82].mxu1  ;;  %2531 = vmatmul.mubr.msk.bf16.gmra.mrb[92].mxu0 %vm984_vm0, %v1778_v14 }
 0x413   : > { %v1688_v21 = vadd.f32 %v2875_v20, %v3596_v22  ;;  %v1679_v23 = vpop.f32.mrb[83].mxu1  ;;  %2007 = vmatprep.mubr.bf16.mxu0 %v3130_v6  ;;  %v1757_v24 = vmax.f32 %v1685_v17, 0.0 }
 0x414   : > { %v1680_v29 = vadd.f32 %v3596_v22, %v1679_v23  ;;  %v1755_v26 = vmax.f32 %v1677_v19, 0.0 }
 0x415   : > { %v1758_v25 = vmax.f32 %v1688_v21, 0.0 }
 0x416   : > { %v1756_v27 = vmax.f32 %v1680_v29, 0.0 }
 0x417   : > { %v1780_v28 = vpack.c.bf16 %v1758_v25, %v1757_v24 }
 0x418   : > { %v1779_v41 = vpack.c.bf16 %v1756_v27, %v1755_v26 }
 0x41a   : > { %2532 = vmatmul.mubr.msk.bf16.gmra.mrb[96].mxu0 %vm984_vm0, %v1779_v41 }
 0x41b   : > { %2017 = vmatprep.mubr.bf16.mxu0 %v3130_v6 }
 0x420   : > { %v2878_v30 = vpop.f32.mrb[84].mxu1 }
 0x421   : > { %v1701_v31 = vadd.f32 %v2878_v30, %v3596_v22  ;;  %v1692_v32 = vpop.f32.mrb[85].mxu1 }
 0x422   : > { %v1693_v33 = vadd.f32 %v3596_v22, %v1692_v32  ;;  %v2879_v34 = vpop.f32.mrb[86].mxu1  ;;  %2533 = vmatmul.mubr.msk.bf16.gmra.mrb[100].mxu0 %vm984_vm0, %v1780_v28 }
 0x423   : > { %v1704_v35 = vadd.f32 %v2879_v34, %v3596_v22  ;;  %v1695_v36 = vpop.f32.mrb[87].mxu1  ;;  %2027 = vmatprep.mubr.bf16.mxu0 %v3130_v6  ;;  %v1761_v38 = vmax.f32 %v1701_v31, 0.0 }
 0x424   : > { %v1696_v37 = vadd.f32 %v3596_v22, %v1695_v36  ;;  %v1759_v40 = vmax.f32 %v1693_v33, 0.0 }
 0x425   : > { %v1762_v39 = vmax.f32 %v1704_v35, 0.0 }
 0x426   : > { %v1760_v42 = vmax.f32 %v1696_v37, 0.0 }
 0x427   : > { %v1782_v43 = vpack.c.bf16 %v1762_v39, %v1761_v38 }
 0x428   : > { %v1781_v44 = vpack.c.bf16 %v1760_v42, %v1759_v40 }
 0x429   : > { %2535 = vmatmul.mubr.msk.bf16.vlgmr.msra.gmra.mrb[96].mxu1 %vm984_vm0, %v1782_v43 }
 0x42a   : > { %2534 = vmatmul.mubr.msk.bf16.gmra.mrb[104].mxu0 %vm984_vm0, %v1781_v44  ;;  %2047 = vmatprep.mubr.bf16.mxu1 %v3130_v6 }
 0x430   : > { %v2882_v53 = vpop.f32.mrb[88].mxu1 }
 0x431   : > { %v1717_v45 = vadd.f32 %v2882_v53, %v3596_v22  ;;  %v1708_v46 = vpop.f32.mrb[89].mxu1 }
 0x432   : > { %v1709_v47 = vadd.f32 %v3596_v22, %v1708_v46  ;;  %v2883_v48 = vpop.f32.mrb[90].mxu1 }
 0x433   : > { %v1720_v49 = vadd.f32 %v2883_v48, %v3596_v22  ;;  %v1711_v50 = vpop.f32.mrb[91].mxu1  ;;  %v1765_v52 = vmax.f32 %v1717_v45, 0.0 }
 0x434   : > { %v1712_v51 = vadd.f32 %v3596_v22, %v1711_v50  ;;  %v1763_v55 = vmax.f32 %v1709_v47, 0.0 }
 0x435   : > { %v1766_v54 = vmax.f32 %v1720_v49, 0.0 }
 0x436   : > { %v1764_v56 = vmax.f32 %v1712_v51, 0.0 }
 0x437   : > { %v1784_v57 = vpack.c.bf16 %v1766_v54, %v1765_v52 }
 0x438   : > { %v1783_v58 = vpack.c.bf16 %v1764_v56, %v1763_v55 }
 0x43a   : > { %2536 = vmatmul.mubr.msk.bf16.gmra.mrb[100].mxu1 %vm984_vm0, %v1783_v58 }
 0x43b   : > { %2057 = vmatprep.mubr.bf16.mxu1 %v3130_v6 }
 0x440   : > { %v2886_v59 = vpop.f32.mrb[92].mxu1 }
 0x441   : > { %v1733_v60 = vadd.f32 %v2886_v59, %v3596_v22  ;;  %v1724_v61 = vpop.f32.mrb[93].mxu1 }
 0x442   : > { %v1725_v62 = vadd.f32 %v3596_v22, %v1724_v61  ;;  %v2887_v63 = vpop.f32.mrb[94].mxu1  ;;  %2537 = vmatmul.mubr.msk.bf16.gmra.mrb[104].mxu1 %vm984_vm0, %v1784_v57 }
 0x443   : > { %v1736_v0 = vadd.f32 %v2887_v63, %v3596_v22  ;;  %v1727_v1 = vpop.f32.mrb[95].mxu1  ;;  %2067 = vmatprep.mubr.bf16.mxu1 %v3130_v6  ;;  %v1769_v3 = vmax.f32 %v1733_v60, 0.0 }
 0x444   : > { %v1728_v2 = vadd.f32 %v3596_v22, %v1727_v1  ;;  %v1767_v5 = vmax.f32 %v1725_v62, 0.0  ;;  %v1795_v22 = vld [vmem:[%s3828_s10] sm:$0x3] }
 0x445   : > { %v1770_v4 = vmax.f32 %v1736_v0, 0.0  ;;  %v3663_v14 = vrot.slane %v1795_v22, %v1799_v12  ;;  %v3665_v15 = vrot.slane %v1795_v22, %v1803_v13 }
 0x446   : > { %v1768_v7 = vmax.f32 %v1728_v2, 0.0 }
 0x447   : > { %v1786_v8 = vpack.c.bf16 %v1770_v4, %v1769_v3 }
 0x448   : > { %v1785_v9 = vpack.c.bf16 %v1768_v7, %v1767_v5 }
 0x44a   : > { %2538 = vmatmul.mubr.msk.bf16.gmra.mrb[108].mxu1 %vm984_vm0, %v1785_v9 }
 0x44b   : > { %2077 = vmatprep.mubr.bf16.mxu1 %v3130_v6 }
 0x452   : > { %2539 = vmatmul.mubr.msk.bf16.gmra.mrb[112].mxu1 %vm984_vm0, %v1786_v8 }
 0x4ad   : > { %v1929_v16 = vpop.f32.mrb[64].mxu0 }
 0x4ae   : > { %v1930_v17 = vadd.f32 %v1929_v16, %v3663_v14  ;;  %v1931_v18 = vpop.f32.mrb[65].mxu0 }
 0x4af   : > { %v1932_v6 = vadd.f32 %v1931_v18, %v3665_v15  ;;  %v1933_v19 = vpop.f32.mrb[66].mxu0 }
 0x4b0   : > { %v1934_v20 = vadd.f32 %v1933_v19, %v3663_v14  ;;  %v1935_v21 = vpop.f32.mrb[67].mxu0 }
 0x4b1   : > { %v2580_v23 = vpack.c.bf16 %v1932_v6, %v1930_v17  ;;  %v1936_v29 = vadd.f32 %v1935_v21, %v3665_v15 }
 0x4b3   : > { %2280 = vst [vmem:[%s3673_s28] sm:$0xff] %v2580_v23  ;;  %v2581_v24 = vpack.c.bf16 %v1936_v29, %v1934_v20 }
 0x4b5   : > { %2281 = vst [vmem:[%s3673_s28 + $0x8] sm:$0xff] %v2581_v24  ;;  %v1939_v25 = vpop.f32.mrb[68].mxu0 }
 0x4b6   : > { %v1940_v26 = vadd.f32 %v1939_v25, %v3663_v14  ;;  %v1941_v27 = vpop.f32.mrb[69].mxu0 }
 0x4b7   : > { %v1942_v28 = vadd.f32 %v1941_v27, %v3665_v15  ;;  %v1943_v41 = vpop.f32.mrb[70].mxu0 }
 0x4b8   : > { %v1944_v30 = vadd.f32 %v1943_v41, %v3663_v14  ;;  %v1945_v31 = vpop.f32.mrb[71].mxu0 }
 0x4b9   : > { %v2582_v32 = vpack.c.bf16 %v1942_v28, %v1940_v26  ;;  %v1946_v33 = vadd.f32 %v1945_v31, %v3665_v15 }
 0x4bb   : > { %2282 = vst [vmem:[%s3673_s28 + $0x10] sm:$0xff] %v2582_v32  ;;  %v2583_v34 = vpack.c.bf16 %v1946_v33, %v1944_v30 }
 0x4bd   : > { %2283 = vst [vmem:[%s3673_s28 + $0x18] sm:$0xff] %v2583_v34  ;;  %v1949_v35 = vpop.f32.mrb[72].mxu0 }
 0x4be   : > { %v1950_v36 = vadd.f32 %v1949_v35, %v3663_v14  ;;  %v1951_v37 = vpop.f32.mrb[73].mxu0 }
 0x4bf   : > { %v1952_v38 = vadd.f32 %v1951_v37, %v3665_v15  ;;  %v1953_v39 = vpop.f32.mrb[74].mxu0 }
 0x4c0   : > { %v1954_v40 = vadd.f32 %v1953_v39, %v3663_v14  ;;  %v1955_v42 = vpop.f32.mrb[75].mxu0 }
 0x4c1   : > { %v2584_v43 = vpack.c.bf16 %v1952_v38, %v1950_v36  ;;  %v1956_v44 = vadd.f32 %v1955_v42, %v3665_v15 }
 0x4c3   : > { %2284 = vst [vmem:[%s3673_s28 + $0x20] sm:$0xff] %v2584_v43  ;;  %v2585_v53 = vpack.c.bf16 %v1956_v44, %v1954_v40 }
 0x4c5   : > { %2285 = vst [vmem:[%s3673_s28 + $0x28] sm:$0xff] %v2585_v53  ;;  %v1959_v45 = vpop.f32.mrb[76].mxu0 }
 0x4c6   : > { %v1960_v46 = vadd.f32 %v1959_v45, %v3663_v14  ;;  %v1961_v47 = vpop.f32.mrb[77].mxu0 }
 0x4c7   : > { %v1962_v48 = vadd.f32 %v1961_v47, %v3665_v15  ;;  %v1963_v49 = vpop.f32.mrb[78].mxu0 }
 0x4c8   : > { %v1964_v50 = vadd.f32 %v1963_v49, %v3663_v14  ;;  %v1965_v51 = vpop.f32.mrb[79].mxu0 }
 0x4c9   : > { %v2586_v52 = vpack.c.bf16 %v1962_v48, %v1960_v46  ;;  %v1966_v54 = vadd.f32 %v1965_v51, %v3665_v15 }
 0x4cb   : > { %2286 = vst [vmem:[%s3673_s28 + $0x30] sm:$0xff] %v2586_v52  ;;  %v2587_v55 = vpack.c.bf16 %v1966_v54, %v1964_v50 }
 0x4cd   : > { %2287 = vst [vmem:[%s3673_s28 + $0x38] sm:$0xff] %v2587_v55  ;;  %v1969_v56 = vpop.f32.mrb[80].mxu0 }
 0x4ce   : > { %v1970_v57 = vadd.f32 %v1969_v56, %v3663_v14  ;;  %v1971_v58 = vpop.f32.mrb[81].mxu0 }
 0x4cf   : > { %v1972_v59 = vadd.f32 %v1971_v58, %v3665_v15  ;;  %v1973_v60 = vpop.f32.mrb[82].mxu0 }
 0x4d0   : > { %v1974_v61 = vadd.f32 %v1973_v60, %v3663_v14  ;;  %v1975_v62 = vpop.f32.mrb[83].mxu0 }
 0x4d1   : > { %v2588_v63 = vpack.c.bf16 %v1972_v59, %v1970_v57  ;;  %v1976_v0 = vadd.f32 %v1975_v62, %v3665_v15 }
 0x4d3   : > { %2288 = vst [vmem:[%s3673_s28 + $0x40] sm:$0xff] %v2588_v63  ;;  %v2589_v1 = vpack.c.bf16 %v1976_v0, %v1974_v61 }
 0x4d5   : > { %2289 = vst [vmem:[%s3673_s28 + $0x48] sm:$0xff] %v2589_v1  ;;  %v1979_v2 = vpop.f32.mrb[84].mxu0 }
 0x4d6   : > { %v1980_v3 = vadd.f32 %v1979_v2, %v3663_v14  ;;  %v1981_v4 = vpop.f32.mrb[85].mxu0 }
 0x4d7   : > { %v1982_v5 = vadd.f32 %v1981_v4, %v3665_v15  ;;  %v1983_v7 = vpop.f32.mrb[86].mxu0 }
 0x4d8   : > { %v1984_v8 = vadd.f32 %v1983_v7, %v3663_v14  ;;  %v1985_v9 = vpop.f32.mrb[87].mxu0 }
 0x4d9   : > { %v2590_v10 = vpack.c.bf16 %v1982_v5, %v1980_v3  ;;  %v1986_v11 = vadd.f32 %v1985_v9, %v3665_v15 }
 0x4db   : > { %2290 = vst [vmem:[%s3673_s28 + $0x50] sm:$0xff] %v2590_v10  ;;  %v2591_v12 = vpack.c.bf16 %v1986_v11, %v1984_v8 }
 0x4dd   : > { %2291 = vst [vmem:[%s3673_s28 + $0x58] sm:$0xff] %v2591_v12  ;;  %v1989_v22 = vpop.f32.mrb[88].mxu0 }
 0x4de   : > { %v1990_v13 = vadd.f32 %v1989_v22, %v3663_v14  ;;  %v1991_v16 = vpop.f32.mrb[89].mxu0 }
 0x4df   : > { %v1992_v17 = vadd.f32 %v1991_v16, %v3665_v15  ;;  %v1993_v18 = vpop.f32.mrb[90].mxu0 }
 0x4e0   : > { %v1994_v6 = vadd.f32 %v1993_v18, %v3663_v14  ;;  %v1995_v19 = vpop.f32.mrb[91].mxu0 }
 0x4e1   : > { %v2592_v20 = vpack.c.bf16 %v1992_v17, %v1990_v13  ;;  %v1996_v21 = vadd.f32 %v1995_v19, %v3665_v15 }
 0x4e3   : > { %2292 = vst [vmem:[%s3673_s28 + $0x60] sm:$0xff] %v2592_v20  ;;  %v2593_v23 = vpack.c.bf16 %v1996_v21, %v1994_v6 }
 0x4e5   : > { %2293 = vst [vmem:[%s3673_s28 + $0x68] sm:$0xff] %v2593_v23  ;;  %v1999_v29 = vpop.f32.mrb[92].mxu0 }
 0x4e6   : > { %v2000_v24 = vadd.f32 %v1999_v29, %v3663_v14  ;;  %v2001_v25 = vpop.f32.mrb[93].mxu0 }
 0x4e7   : > { %v2002_v26 = vadd.f32 %v2001_v25, %v3665_v15  ;;  %v2003_v27 = vpop.f32.mrb[94].mxu0 }
 0x4e8   : > { %v2004_v28 = vadd.f32 %v2003_v27, %v3663_v14  ;;  %v2005_v41 = vpop.f32.mrb[95].mxu0 }
 0x4e9   : > { %v2594_v30 = vpack.c.bf16 %v2002_v26, %v2000_v24  ;;  %v2006_v31 = vadd.f32 %v2005_v41, %v3665_v15 }
 0x4eb   : > { %2294 = vst [vmem:[%s3673_s28 + $0x70] sm:$0xff] %v2594_v30  ;;  %v2595_v32 = vpack.c.bf16 %v2006_v31, %v2004_v28 }
 0x4ed   : > { %2295 = vst [vmem:[%s3673_s28 + $0x78] sm:$0xff] %v2595_v32  ;;  %v2009_v33 = vpop.f32.mrb[96].mxu0 }
 0x4ee   : > { %v2010_v34 = vadd.f32 %v2009_v33, %v3663_v14  ;;  %v2011_v35 = vpop.f32.mrb[97].mxu0 }
 0x4ef   : > { %v2012_v36 = vadd.f32 %v2011_v35, %v3665_v15  ;;  %v2013_v37 = vpop.f32.mrb[98].mxu0 }
 0x4f0   : > { %v2014_v38 = vadd.f32 %v2013_v37, %v3663_v14  ;;  %v2015_v39 = vpop.f32.mrb[99].mxu0 }
 0x4f1   : > { %v2596_v40 = vpack.c.bf16 %v2012_v36, %v2010_v34  ;;  %v2016_v42 = vadd.f32 %v2015_v39, %v3665_v15 }
 0x4f3   : > { %2296 = vst [vmem:[%s3673_s28 + $0x80] sm:$0xff] %v2596_v40  ;;  %v2597_v43 = vpack.c.bf16 %v2016_v42, %v2014_v38 }
 0x4f5   : > { %2297 = vst [vmem:[%s3673_s28 + $0x88] sm:$0xff] %v2597_v43  ;;  %v2019_v44 = vpop.f32.mrb[100].mxu0 }
 0x4f6   : > { %v2020_v53 = vadd.f32 %v2019_v44, %v3663_v14  ;;  %v2021_v45 = vpop.f32.mrb[101].mxu0 }
 0x4f7   : > { %v2022_v46 = vadd.f32 %v2021_v45, %v3665_v15  ;;  %v2023_v47 = vpop.f32.mrb[102].mxu0 }
 0x4f8   : > { %v2024_v48 = vadd.f32 %v2023_v47, %v3663_v14  ;;  %v2025_v49 = vpop.f32.mrb[103].mxu0 }
 0x4f9   : > { %v2598_v50 = vpack.c.bf16 %v2022_v46, %v2020_v53  ;;  %v2026_v51 = vadd.f32 %v2025_v49, %v3665_v15 }
 0x4fb   : > { %2298 = vst [vmem:[%s3673_s28 + $0x90] sm:$0xff] %v2598_v50  ;;  %v2599_v52 = vpack.c.bf16 %v2026_v51, %v2024_v48 }
 0x4fc   : > { %v2039_v54 = vpop.f32.mrb[96].mxu1 }
 0x4fd   : > { %2299 = vst [vmem:[%s3673_s28 + $0x98] sm:$0xff] %v2599_v52  ;;  %v2040_v55 = vadd.f32 %v2039_v54, %v3663_v14  ;;  %v2029_v56 = vpop.f32.mrb[104].mxu0  ;;  %v2041_v57 = vpop.f32.mrb[97].mxu1 }
 0x4fe   : > { %v2030_v58 = vadd.f32 %v2029_v56, %v3663_v14  ;;  %v2042_v59 = vadd.f32 %v2041_v57, %v3665_v15  ;;  %v2031_v60 = vpop.f32.mrb[105].mxu0  ;;  %v2043_v61 = vpop.f32.mrb[98].mxu1 }
 0x4ff   : > { %v2032_v62 = vadd.f32 %v2031_v60, %v3665_v15  ;;  %v2044_v63 = vadd.f32 %v2043_v61, %v3663_v14  ;;  %v2033_v0 = vpop.f32.mrb[106].mxu0  ;;  %v2045_v1 = vpop.f32.mrb[99].mxu1 }
 0x500   : > { %v2602_v2 = vpack.c.bf16 %v2042_v59, %v2040_v55  ;;  %v2034_v3 = vadd.f32 %v2033_v0, %v3663_v14  ;;  %v2046_v4 = vadd.f32 %v2045_v1, %v3665_v15  ;;  %v2035_v5 = vpop.f32.mrb[107].mxu0 }
 0x501   : > { %v2600_v7 = vpack.c.bf16 %v2032_v62, %v2030_v58  ;;  %v2036_v8 = vadd.f32 %v2035_v5, %v3665_v15 }
 0x502   : > { %2302 = vst [vmem:[%s3673_s28 + $0xb0] sm:$0xff] %v2602_v2  ;;  %v2603_v9 = vpack.c.bf16 %v2046_v4, %v2044_v63 }
 0x503   : > { %2300 = vst [vmem:[%s3673_s28 + $0xa0] sm:$0xff] %v2600_v7  ;;  %v2601_v10 = vpack.c.bf16 %v2036_v8, %v2034_v3 }
 0x504   : > { %2303 = vst [vmem:[%s3673_s28 + $0xb8] sm:$0xff] %v2603_v9 }
 0x505   : > { %2301 = vst [vmem:[%s3673_s28 + $0xa8] sm:$0xff] %v2601_v10 }
 0x50d   : > { %v2049_v11 = vpop.f32.mrb[100].mxu1 }
 0x50e   : > { %v2050_v12 = vadd.f32 %v2049_v11, %v3663_v14  ;;  %v2051_v22 = vpop.f32.mrb[101].mxu1 }
 0x50f   : > { %v2052_v13 = vadd.f32 %v2051_v22, %v3665_v15  ;;  %v2053_v16 = vpop.f32.mrb[102].mxu1 }
 0x510   : > { %v2054_v17 = vadd.f32 %v2053_v16, %v3663_v14  ;;  %v2055_v18 = vpop.f32.mrb[103].mxu1 }
 0x511   : > { %v2604_v6 = vpack.c.bf16 %v2052_v13, %v2050_v12  ;;  %v2056_v19 = vadd.f32 %v2055_v18, %v3665_v15 }
 0x513   : > { %2304 = vst [vmem:[%s3673_s28 + $0xc0] sm:$0xff] %v2604_v6  ;;  %v2605_v20 = vpack.c.bf16 %v2056_v19, %v2054_v17 }
 0x515   : > { %2305 = vst [vmem:[%s3673_s28 + $0xc8] sm:$0xff] %v2605_v20  ;;  %v2059_v21 = vpop.f32.mrb[104].mxu1 }
 0x516   : > { %v2060_v23 = vadd.f32 %v2059_v21, %v3663_v14  ;;  %v2061_v29 = vpop.f32.mrb[105].mxu1 }
 0x517   : > { %v2062_v24 = vadd.f32 %v2061_v29, %v3665_v15  ;;  %v2063_v25 = vpop.f32.mrb[106].mxu1 }
 0x518   : > { %v2064_v26 = vadd.f32 %v2063_v25, %v3663_v14  ;;  %v2065_v27 = vpop.f32.mrb[107].mxu1 }
 0x519   : > { %v2606_v28 = vpack.c.bf16 %v2062_v24, %v2060_v23  ;;  %v2066_v41 = vadd.f32 %v2065_v27, %v3665_v15 }
 0x51b   : > { %2306 = vst [vmem:[%s3673_s28 + $0xd0] sm:$0xff] %v2606_v28  ;;  %v2607_v30 = vpack.c.bf16 %v2066_v41, %v2064_v26 }
 0x51d   : > { %2307 = vst [vmem:[%s3673_s28 + $0xd8] sm:$0xff] %v2607_v30  ;;  %v2069_v31 = vpop.f32.mrb[108].mxu1 }
 0x51e   : > { %v2070_v32 = vadd.f32 %v2069_v31, %v3663_v14  ;;  %v2071_v33 = vpop.f32.mrb[109].mxu1 }
 0x51f   : > { %v2072_v34 = vadd.f32 %v2071_v33, %v3665_v15  ;;  %v2073_v35 = vpop.f32.mrb[110].mxu1 }
 0x520   : > { %v2074_v36 = vadd.f32 %v2073_v35, %v3663_v14  ;;  %v2075_v37 = vpop.f32.mrb[111].mxu1 }
 0x521   : > { %v2608_v38 = vpack.c.bf16 %v2072_v34, %v2070_v32  ;;  %v2076_v39 = vadd.f32 %v2075_v37, %v3665_v15 }
 0x523   : > { %2308 = vst [vmem:[%s3673_s28 + $0xe0] sm:$0xff] %v2608_v38  ;;  %v2609_v40 = vpack.c.bf16 %v2076_v39, %v2074_v36 }
 0x525   : > { %2309 = vst [vmem:[%s3673_s28 + $0xe8] sm:$0xff] %v2609_v40  ;;  %v2079_v42 = vpop.f32.mrb[112].mxu1 }
 0x526   : > { %v2080_v43 = vadd.f32 %v2079_v42, %v3663_v14  ;;  %v2081_v44 = vpop.f32.mrb[113].mxu1 }
 0x527   : > { %v2082_v53 = vadd.f32 %v2081_v44, %v3665_v15  ;;  %v2083_v45 = vpop.f32.mrb[114].mxu1 }
 0x528   : > { %v2084_v46 = vadd.f32 %v2083_v45, %v3663_v14  ;;  %v2085_v47 = vpop.f32.mrb[115].mxu1 }
 0x529   : > { %v2610_v48 = vpack.c.bf16 %v2082_v53, %v2080_v43  ;;  %v2086_v49 = vadd.f32 %v2085_v47, %v3665_v15 }
 0x52b   : > { %2310 = vst [vmem:[%s3673_s28 + $0xf0] sm:$0xff] %v2610_v48  ;;  %v2611_v50 = vpack.c.bf16 %v2086_v49, %v2084_v46 }
 0x52d   : > { %2311 = vst [vmem:[%s3673_s28 + $0xf8] sm:$0xff] %v2611_v50 }
 0x52e   : > { %3072 = shalt.err (!%p3069_p2)
}
 0x52f   : > { %s3073_s14 = scalar_lea.hbm %s3770_s25, 4096  ;;  %s3077_s26 = scalar_lea.hbm %s3829_s11, 8192 }
 0x530   : > { %p3074_p4 = scmp.ne.s32.totalorder %s3770_s25, %s3073_s14  ;;  %p3078_p9 = scmp.lt.u32.totalorder %s3770_s25, %s3829_s11 }
 0x531   : > { %p3079_p1 = scmp.lt.u32.totalorder %s3077_s26, %s3073_s14  ;;  %p3081_p6 = scmp.lt.u32.totalorder %s3073_s14, %s3770_s25 }
 0x532   : > { %p3075_p5 = pnand %p3074_p4, %p3841_p11 }
 0x533   : > { %p3080_p3 = por %p3079_p1, %p3078_p9 }
 0x534   : > { %p3076_p7 = pneg %p3075_p5 }
 0x535   : > { %p3082_p12 = por %p3081_p6, %p3080_p3 }
 0x537   : > { %p3083_p13 = pnand %p3082_p12, %p3076_p7 }
 0x539   : > { %3086 = shalt.err (!%p3083_p13)
}
 0x53a   : > { %s3132_s27 = smov 128   ;;  %s3133_s12 = smov 8  }
 0x53b   : > { %2898 = dma.vmem_to_hbm [thread:$0]  (%p3841_p11), %s3772_s19, 4096, %s3770_s25, %s2313_s21, %s3132_s27, %s3132_s27, %s3133_s12  }
 0x53c PF: > { %s2342_s15 = sand.u32 1, %s3113_s17   ;;  %p3842_p8 = scmp.ne.s32.totalorder %s3838_s30, 0 }
 0x53d   : > { %p3843_p10 = scmp.ge.s32.totalorder %s3125_s20, 2  ;;  %s2343_s14 = scalar_lea.sflag [#allocation4], %s2342_s15 }
 0x53f   : > { %p2905_p0 = pnand %p3843_p10, %p3842_p8 }
 0x541   : > { %3108 = dma.done.wait (!%p2905_p0), %s2343_s14, 4096  }
 0x542   : > { %3110 = vsyncadd (!%p2905_p0), %s2343_s14, 4294963200  ;;  %s3844_s28 = sld [smem:[#allocation8_spill]]  ;;  %s3845_s19 = sld [smem:[#allocation9_spill]] }
 0x543   : > { %p24_p2 = scmp.ge.s32.totalorder %s3219_s23, 4   ;;  %s3846_s17 = smov %s3117_s18 }
 0x544   : > { %s3848_s20 = smov %s3219_s23 }
 0x545   :  { %26 = sbr.rel (!%p24_p2) target bundleno = 5 (0x5), region = 109 }
 0x548   : > { %s3847_s18 = smov %s3844_s28 }
 0x54c   :  { %2348 = vsyncpa [#allocation3], 1 }
 0x54d   :  { %2350 = vsyncpa [#allocation3 + $0x1], 1 }
 0x54e   :  { %2351 = vsyncpa [#allocation4], 1 }
 0x54f   :  { %2353 = vsyncpa [#allocation4 + $0x1], 1 }

</bundles_post_ra>
